<compile_context>
chip_gen: v7x
topology: tpu7x:2x2x1
jax: 0.10.0
libtpu: 0.0.40
codegen_flags: <defaults>
</compile_context>

<pallas_src>
import functools

import numpy as np
import jax
import jax.numpy as jnp
from jax import lax
from jax.experimental import pallas as pl
from jax.experimental.pallas import tpu as pltpu

_EPS = 1e-5
_F32 = jnp.float32
_BF16 = jnp.bfloat16
_LANE = 128


def _round_up(v, m):
    return (v + m - 1) // m * m


def _sigmoid(v):
    # numerically stable sigmoid on the tanh (EUP) path
    return 0.5 * (jnp.tanh(0.5 * v) + 1.0)


def _bn_scale_offset(st_ref, g_ref, be_ref, cnt):
    """Fold training-mode BatchNorm1d into a per-channel scale/offset.

    st_ref: (2, C) ref, rows = [sum, sum-of-squares] over the full (N, L) batch.
    Returns (scale, offset), each (1, C) f32, so that bn(x) = x*scale + offset.
    NOTE: E[x^2]-E[x]^2 in f32 can cancel for very large N*L / magnitudes.
    """
    mu = st_ref[0:1, :] * (1.0 / cnt)
    var = jnp.maximum(st_ref[1:2, :] * (1.0 / cnt) - mu * mu, 0.0)
    scale = g_ref[...] * jax.lax.rsqrt(var + _EPS)
    return scale, be_ref[...] - mu * scale


def _accumulate_stats(st_ref, h):
    """st_ref: (2, C) accumulator; add per-channel [sum, sum-of-squares] of h (f32)."""
    h2d = h.reshape(-1, h.shape[-1])
    st_ref[0:1, :] += jnp.sum(h2d, axis=0, keepdims=True)
    st_ref[1:2, :] += jnp.sum(h2d * h2d, axis=0, keepdims=True)


def _conv1d_k3_im2col(h, wflat_ref, col_ref):
    """kernel-3 / stride-1 / 'same' Conv1d via a single im2col MXU matmul.

    h: (TB, L, C) f32; wflat_ref: (3*C, Co) bf16 (w[d,c,o] flattened over (d,c));
    col_ref: (TB, L, 3*C) f32 VMEM scratch.
    col[..., d*C + c] = input channel c at index i + d - 1 (zero 'same' padding).
    """
    tb, l, c = h.shape
    co = wflat_ref.shape[-1]
    col_ref[:, 1:l, 0:c] = h[:, 0:l - 1, :]            # tap d=0: index i-1
    col_ref[:, :, c:2 * c] = h                         # tap d=1: index i
    col_ref[:, 0:l - 1, 2 * c:3 * c] = h[:, 1:l, :]    # tap d=2: index i+1
    # only the two halo rows need zeros (no full-scratch clear)
    zrow = jnp.zeros((tb, 1, c), col_ref.dtype)
    col_ref[:, 0:1, 0:c] = zrow
    col_ref[:, l - 1:l, 2 * c:3 * c] = zrow
    win = col_ref[...].reshape(tb * l, 3 * c).astype(_BF16)
    return jnp.dot(win, wflat_ref[...],
                   preferred_element_type=_F32).reshape(tb, l, co)


# ---------------- pass 1: conv1 + BN1 stats (+ res-BN stats from recomputable sk) ----
def _pass1_kernel(x_ref, w1_ref, wr_ref, h1_ref, st1_ref, str_ref, col_ref):
    x = x_ref[...]                                             # (TB, L, Ci) f32
    tb, l, ci = x.shape
    h1 = _conv1d_k3_im2col(x, w1_ref, col_ref)                 # (TB, L, Co_p) f32
    sk = jnp.dot(x.reshape(tb * l, ci).astype(_BF16), wr_ref[...],
                 preferred_element_type=_F32).reshape(tb, l, -1)
    h1_ref[...] = h1.astype(h1_ref.dtype)                      # bf16 HBM store

    @pl.when(pl.program_id(0) == 0)
    def _init():
        st1_ref[...] = jnp.zeros_like(st1_ref)
        str_ref[...] = jnp.zeros_like(str_ref)

    _accumulate_stats(st1_ref, h1)                             # from f32, pre-downcast
    _accumulate_stats(str_ref, sk)


# ---------------- pass 2: bn1 + relu + conv2 + BN2 stats ----------------
def _pass2_kernel(h1_ref, st1_ref, g1_ref, be1_ref, w2_ref,
                  h2_ref, st2_ref, col_ref, *, cnt):
    scale, off = _bn_scale_offset(st1_ref, g1_ref, be1_ref, cnt)
    a = jnp.maximum(h1_ref[...].astype(_F32) * scale[None] + off[None], 0.0)
    h2 = _conv1d_k3_im2col(a, w2_ref, col_ref)
    h2_ref[...] = h2.astype(h2_ref.dtype)                      # bf16 HBM store

    @pl.when(pl.program_id(0) == 0)
    def _init():
        st2_ref[...] = jnp.zeros_like(st2_ref)

    _accumulate_stats(st2_ref, h2)                             # from f32, pre-downcast


# ---------------- pass 3: bn2 + CBAM + recomputed skip + residual + relu ----------------
def _pass3_kernel(x_ref, h2_ref, st2_ref, g2_ref, be2_ref,
                  str_ref, gr_ref, ber_ref, wr_ref,
                  wc1_ref, wc2_ref, ws_ref, o_ref, sp_ref, *, cnt, c_out):
    tb, l, cp = h2_ref.shape
    scale2, off2 = _bn_scale_offset(st2_ref, g2_ref, be2_ref, cnt)
    h = h2_ref[...].astype(_F32) * scale2[None] + off2[None]   # (TB, L, Cp) f32

    # CBAM channel attention: stack avg/max pools (over L), run the shared MLP once.
    p = jnp.concatenate([jnp.mean(h, axis=1), jnp.max(h, axis=1)], axis=0)  # (2TB, Cp)
    q = jnp.dot(p.astype(_BF16), wc1_ref[...], preferred_element_type=_F32)
    q = jnp.dot(jnp.maximum(q, 0.0).astype(_BF16), wc2_ref[...],
                preferred_element_type=_F32)                   # (2TB, Cp) f32
    c_w = _sigmoid(q[0:tb, :] + q[tb:2 * tb, :])               # (TB, Cp)
    h = h * c_w[:, None, :]

    # CBAM spatial attention: k=7 'same' conv over L as 7 shifted-slice FMAs.
    # Channel padding must not contaminate the pools: divide by the true C for
    # the mean and mask padded lanes out of the max.
    chan_mask = lax.broadcasted_iota(jnp.int32, (1, 1, cp), 2) < c_out
    zc = jnp.zeros((2 * tb, 3), _F32)
    sp_ref[:, 0:3] = zc                                        # halo columns only
    sp_ref[:, l + 3:l + 6] = zc
    sp_ref[0:tb, 3:3 + l] = jnp.sum(h, axis=2) * (1.0 / c_out)
    sp_ref[tb:2 * tb, 3:3 + l] = jnp.max(jnp.where(chan_mask, h, -1e30), axis=2)
    s_acc = jnp.zeros((tb, l), _F32)
    for t in range(7):                       # tap t reads input index i + t - 3
        s_acc = (s_acc
                 + ws_ref[0, t] * sp_ref[0:tb, t:t + l]
                 + ws_ref[1, t] * sp_ref[tb:2 * tb, t:t + l])
    h = h * _sigmoid(s_acc)[:, :, None]

    # skip branch: recompute res_conv from the small x tile (cheaper than an
    # (N, L, Co) HBM round trip), apply res-BN, add, final relu.
    x = x_ref[...]                                             # (TB, L, Ci) f32
    ci = x.shape[-1]
    sk = jnp.dot(x.reshape(tb * l, ci).astype(_BF16), wr_ref[...],
                 preferred_element_type=_F32).reshape(tb, l, cp)
    scaler, offr = _bn_scale_offset(str_ref, gr_ref, ber_ref, cnt)
    y = jnp.maximum(h + sk * scaler[None] + offr[None], 0.0)

    o_ref[...] = y[:, :, :c_out]                               # drop channel padding


@functools.partial(jax.jit, static_argnames=("batch_tile", "vmem_limit_bytes"))
def residual_cbam_forward(x_ncl, params, *, batch_tile=None,
                          vmem_limit_bytes=48 * 1024 * 1024):
    """x_ncl: (N, C_in, L) float32 (PyTorch Conv1d layout). Returns (N, C_out, L)."""
    # TODO(synk): fold this transpose (and the output one below) into pass 1/3.
    x = jnp.transpose(x_ncl, (0, 2, 1)).astype(_F32)           # (N, L, Ci)
    n, l, ci = x.shape
    co = params['w1'].shape[2]
    co_p = _round_up(co, _LANE)                                # lane-dense channel dim
    pc = co_p - co
    cnt = float(n * l)

    if batch_tile is None:
        # pick the biggest batch tile that keeps the heaviest pass inside VMEM
        per_row = 32 * l * co_p                                # ~pass-2 bytes / batch row
        fixed = 16 * co_p * co_p + (1 << 20)                   # dbl-buffered weights + slack
        budget = max((vmem_limit_bytes * 3) // 4 - fixed, per_row)
        batch_tile = max(d for d in range(1, n + 1)
                         if n % d == 0 and d * per_row <= budget)
    tb = batch_tile
    assert n % tb == 0
    nb = n // tb

    # zero-pad every C_out-sized axis to co_p; gamma/beta padded with 0 so padded
    # channels stay exactly 0 through BN/ReLU/CBAM and are sliced off at the end.
    w1f = jnp.pad(params['w1'], ((0, 0), (0, 0), (0, pc))).astype(_BF16).reshape(3 * ci, co_p)
    w2f = jnp.pad(params['w2'], ((0, 0), (0, pc), (0, pc))).astype(_BF16).reshape(3 * co_p, co_p)
    wr = jnp.pad(params['wr'], ((0, 0), (0, pc))).astype(_BF16)            # (Ci, Co_p)
    wc1 = jnp.pad(params['wc1'], ((0, pc), (0, 0))).astype(_BF16)          # (Co_p, Cr)
    wc2 = jnp.pad(params['wc2'], ((0, 0), (0, pc))).astype(_BF16)          # (Cr, Co_p)
    ws = params['ws'].astype(_F32)                                         # (2, 7)
    row = lambda a: jnp.pad(a, ((0, pc),)).reshape(1, co_p).astype(_F32)
    g1, be1 = row(params['g1']), row(params['be1'])
    g2, be2 = row(params['g2']), row(params['be2'])
    gr, ber = row(params['gr']), row(params['ber'])

    def act(c):                                                # batch-tiled activations
        return pl.BlockSpec((tb, l, c), lambda i: (i, 0, 0))

    def whole(shape):                                          # replicated small operand
        nd = len(shape)
        return pl.BlockSpec(tuple(shape), lambda i: (0,) * nd)

    def cparams(sem):
        return pltpu.CompilerParams(dimension_semantics=(sem,),
                                    vmem_limit_bytes=vmem_limit_bytes)

    h_bf16 = jax.ShapeDtypeStruct((n, l, co_p), _BF16)         # bf16 HBM intermediates
    stat = jax.ShapeDtypeStruct((2, co_p), _F32)

    # ---- pass 1: conv1 (im2col) + BN1 stats; res_conv only feeds res-BN stats ----
    h1, st1, st_r = pl.pallas_call(
        _pass1_kernel,
        grid=(nb,),
        in_specs=[act(ci), whole(w1f.shape), whole(wr.shape)],
        out_specs=[act(co_p), whole((2, co_p)), whole((2, co_p))],
        out_shape=[h_bf16, stat, stat],
        scratch_shapes=[pltpu.VMEM((tb, l, 3 * ci), _F32)],
        compiler_params=cparams("arbitrary"),   # stat accumulators revisit their block
    )(x, w1f, wr)

    # ---- pass 2: bn1 + relu + conv2 (im2col) + BN2 stats ----
    h2, st2 = pl.pallas_call(
        functools.partial(_pass2_kernel, cnt=cnt),
        grid=(nb,),
        in_specs=[act(co_p), whole((2, co_p)), whole((1, co_p)), whole((1, co_p)),
                  whole(w2f.shape)],
        out_specs=[act(co_p), whole((2, co_p))],
        out_shape=[h_bf16, stat],
        scratch_shapes=[pltpu.VMEM((tb, l, 3 * co_p), _F32)],
        compiler_params=cparams("arbitrary"),
    )(h1, st1, g1, be1, w2f)

    # ---- pass 3: bn2 + CBAM + recomputed skip + res-bn + add + relu (per-tile) ----
    y = pl.pallas_call(
        functools.partial(_pass3_kernel, cnt=cnt, c_out=co),
        grid=(nb,),
        in_specs=[act(ci), act(co_p), whole((2, co_p)), whole((1, co_p)), whole((1, co_p)),
                  whole((2, co_p)), whole((1, co_p)), whole((1, co_p)),
                  whole(wr.shape), whole(wc1.shape), whole(wc2.shape),
                  pl.BlockSpec(memory_space=pltpu.MemorySpace.SMEM)],
        out_specs=act(co),
        out_shape=jax.ShapeDtypeStruct((n, l, co), _F32),
        scratch_shapes=[pltpu.VMEM((2 * tb, l + 6), _F32)],    # padded spatial maps
        compiler_params=cparams("parallel"),    # megacore-shardable
    )(x, h2, st2, g2, be2, st_r, gr, ber, wr, wc1, wc2, ws)

    return jnp.transpose(y, (0, 2, 1))                         # back to (N, C_out, L)


def reference(x_ncl, p):
    """Pure-JAX f32 reference of the PyTorch forward (training-mode BN, conv
    biases included -- they cancel against the BN mean, so the bias-free kernel
    must still match)."""
    x = jnp.transpose(x_ncl, (0, 2, 1)).astype(_F32)           # (N, L, Ci)
    l = x.shape[1]

    def shift(h, s):        # y[:, i, :] = h[:, i+s, :], zero padded
        if s == 0:
            return h
        if s > 0:
            return jnp.concatenate([h[:, s:, :], jnp.zeros_like(h[:, :s, :])], axis=1)
        return jnp.concatenate([jnp.zeros_like(h[:, :-s, :]), h[:, :s, :]], axis=1)

    def conv3(h, w, b):     # tap d reads input index i + d - 1
        return sum(jnp.einsum('nic,co->nio', shift(h, d - 1), w[d])
                   for d in range(3)) + b

    def bn(h, g, be):       # training-mode BatchNorm1d, biased variance
        mu = jnp.mean(h, axis=(0, 1), keepdims=True)
        var = jnp.mean(jnp.square(h - mu), axis=(0, 1), keepdims=True)
        return (h - mu) * jax.lax.rsqrt(var + _EPS) * g + be

    skip = bn(jnp.einsum('nic,co->nio', x, p['wr']) + p['br'], p['gr'], p['ber'])
    h = jnp.maximum(bn(conv3(x, p['w1'], p['b1']), p['g1'], p['be1']), 0.0)
    h = bn(conv3(h, p['w2'], p['b2']), p['g2'], p['be2'])

    mlp = lambda v: jnp.maximum(v @ p['wc1'], 0.0) @ p['wc2']
    c_w = jax.nn.sigmoid(mlp(jnp.mean(h, axis=1)) + mlp(jnp.max(h, axis=1)))
    h = h * c_w[:, None, :]

    avg_p = jnp.pad(jnp.mean(h, axis=2), ((0, 0), (3, 3)))
    max_p = jnp.pad(jnp.max(h, axis=2), ((0, 0), (3, 3)))
    s = sum(p['ws'][0, t] * avg_p[:, t:t + l] + p['ws'][1, t] * max_p[:, t:t + l]
            for t in range(7))
    h = h * jax.nn.sigmoid(s)[:, :, None]

    return jnp.transpose(jnp.maximum(h + skip, 0.0), (0, 2, 1))


def make_params(key, c_in, c_out):
    ks = jax.random.split(key, 15)
    rnd = lambda k, shape, s=0.1: s * jax.random.normal(k, shape, dtype=_F32)
    c_r = max(c_out // 8, 1)
    return {
        'w1': rnd(ks[0], (3, c_in, c_out)),   # conv1.weight[o, c, d]       -> w1[d, c, o]
        'b1': rnd(ks[1], (c_out,)),
        'g1': 1.0 + rnd(ks[2], (c_out,)),
        'be1': rnd(ks[3], (c_out,)),
        'w2': rnd(ks[4], (3, c_out, c_out)),
        'b2': rnd(ks[5], (c_out,)),
        'g2': 1.0 + rnd(ks[6], (c_out,)),
        'be2': rnd(ks[7], (c_out,)),
        'wc1': rnd(ks[8], (c_out, c_r)),      # cbam c_conv1.weight[r, c, 0] -> wc1[c, r]
        'wc2': rnd(ks[9], (c_r, c_out)),      # cbam c_conv2.weight[c, r, 0] -> wc2[r, c]
        'ws': rnd(ks[10], (2, 7)),            # cbam s_conv.weight[0, j, t]  -> ws[j, t]
        'wr': rnd(ks[11], (c_in, c_out)),     # res_conv.weight[o, c, 0]     -> wr[c, o]
        'br': rnd(ks[12], (c_out,)),
        'gr': 1.0 + rnd(ks[13], (c_out,)),
        'ber': rnd(ks[14], (c_out,)),
    }


if __name__ == "__main__":
    N, C_IN, C_OUT, L = 2, 4, 16, 16
    key = jax.random.PRNGKey(0)
    k_x, k_p = jax.random.split(key)
    x = jax.random.normal(k_x, (N, C_IN, L), dtype=_F32)       # PyTorch NCL layout
    params = make_params(k_p, C_IN, C_OUT)

    out = jax.block_until_ready(residual_cbam_forward(x, params))
    assert out.shape == (N, C_OUT, L)

    ref = jax.block_until_ready(reference(x, params))
    # tolerance sized for bf16 MXU operands / bf16-stored intermediates vs. the
    # all-f32 reference
    np.testing.assert_allclose(np.asarray(out), np.asarray(ref), atol=5e-2, rtol=5e-2)
    print("KERNEL_OK")
</pallas_src>

<mosaic_0001>
module attributes {stable_mosaic.version = 11 : i64} {
  func.func @_pass1_kernel(%arg0: i32, %arg1: memref<2x16x4xf32, #tpu.memory_space<vmem>>, %arg2: memref<12x128xbf16, #tpu.memory_space<vmem>>, %arg3: memref<4x128xbf16, #tpu.memory_space<vmem>>, %arg4: memref<2x16x128xbf16, #tpu.memory_space<vmem>>, %arg5: memref<2x128xf32, #tpu.memory_space<vmem>>, %arg6: memref<2x128xf32, #tpu.memory_space<vmem>>, %arg7: memref<2x16x12xf32, #tpu.memory_space<vmem>>) attributes {dimension_semantics = [#tpu.dimension_semantics<arbitrary>], iteration_bounds = array<i64: 1>, scalar_prefetch = 0 : i64, scratch_operands = 1 : i64, tpu.core_type = #tpu.core_type<tc>, window_params = [{transform_indices = @transform_0, window_bounds = array<i64: 2, 16, 4>}, {pipeline_mode = #tpu.pipeline_mode<synchronous>, transform_indices = @transform_1, window_bounds = array<i64: 12, 128>}, {pipeline_mode = #tpu.pipeline_mode<synchronous>, transform_indices = @transform_2, window_bounds = array<i64: 4, 128>}, {transform_indices = @transform_3, window_bounds = array<i64: 2, 16, 128>}, {pipeline_mode = #tpu.pipeline_mode<synchronous>, transform_indices = @transform_4, window_bounds = array<i64: 2, 128>}, {pipeline_mode = #tpu.pipeline_mode<synchronous>, transform_indices = @transform_5, window_bounds = array<i64: 2, 128>}]} {
    %c0 = arith.constant 0 : index
    %c0_0 = arith.constant 0 : index
    %c0_1 = arith.constant 0 : index
    %0 = vector.load %arg1[%c0, %c0_0, %c0_1] : memref<2x16x4xf32, #tpu.memory_space<vmem>>, vector<2x16x4xf32>
    %1 = vector.extract_strided_slice %0 {offsets = [0, 0, 0], sizes = [2, 15, 4], strides = [1, 1, 1]} : vector<2x16x4xf32> to vector<2x15x4xf32>
    %c0_2 = arith.constant 0 : index
    %c1 = arith.constant 1 : index
    %c0_3 = arith.constant 0 : index
    %2 = vector.load %arg7[%c0_2, %c1, %c0_3] : memref<2x16x12xf32, #tpu.memory_space<vmem>>, vector<2x15x4xf32>
    tpu.vector_store %arg7[%c0_2, %c1, %c0_3], %1 {strides = array<i32>} : memref<2x16x12xf32, #tpu.memory_space<vmem>>, vector<2x15x4xf32>,
    %c0_4 = arith.constant 0 : index
    %c0_5 = arith.constant 0 : index
    %c4 = arith.constant 4 : index
    %3 = vector.load %arg7[%c0_4, %c0_5, %c4] : memref<2x16x12xf32, #tpu.memory_space<vmem>>, vector<2x16x4xf32>
    tpu.vector_store %arg7[%c0_4, %c0_5, %c4], %0 {strides = array<i32>} : memref<2x16x12xf32, #tpu.memory_space<vmem>>, vector<2x16x4xf32>,
    %4 = vector.extract_strided_slice %0 {offsets = [0, 1, 0], sizes = [2, 15, 4], strides = [1, 1, 1]} : vector<2x16x4xf32> to vector<2x15x4xf32>
    %c0_6 = arith.constant 0 : index
    %c0_7 = arith.constant 0 : index
    %c8 = arith.constant 8 : index
    %5 = vector.load %arg7[%c0_6, %c0_7, %c8] : memref<2x16x12xf32, #tpu.memory_space<vmem>>, vector<2x15x4xf32>
    tpu.vector_store %arg7[%c0_6, %c0_7, %c8], %4 {strides = array<i32>} : memref<2x16x12xf32, #tpu.memory_space<vmem>>, vector<2x15x4xf32>,
    %cst = arith.constant 0.000000e+00 : f32
    %6 = vector.broadcast %cst : f32 to vector<2x1x4xf32>
    %c0_8 = arith.constant 0 : index
    %c0_9 = arith.constant 0 : index
    %c0_10 = arith.constant 0 : index
    %7 = vector.load %arg7[%c0_8, %c0_9, %c0_10] : memref<2x16x12xf32, #tpu.memory_space<vmem>>, vector<2x1x4xf32>
    tpu.vector_store %arg7[%c0_8, %c0_9, %c0_10], %6 {strides = array<i32>} : memref<2x16x12xf32, #tpu.memory_space<vmem>>, vector<2x1x4xf32>,
    %c0_11 = arith.constant 0 : index
    %c15 = arith.constant 15 : index
    %c8_12 = arith.constant 8 : index
    %8 = vector.load %arg7[%c0_11, %c15, %c8_12] : memref<2x16x12xf32, #tpu.memory_space<vmem>>, vector<2x1x4xf32>
    tpu.vector_store %arg7[%c0_11, %c15, %c8_12], %6 {strides = array<i32>} : memref<2x16x12xf32, #tpu.memory_space<vmem>>, vector<2x1x4xf32>,
    %c0_13 = arith.constant 0 : index
    %c0_14 = arith.constant 0 : index
    %c0_15 = arith.constant 0 : index
    %9 = vector.load %arg7[%c0_13, %c0_14, %c0_15] : memref<2x16x12xf32, #tpu.memory_space<vmem>>, vector<2x16x12xf32>
    %10 = vector.shape_cast %9 : vector<2x16x12xf32> to vector<32x12xf32>
    %11 = arith.truncf %10 : vector<32x12xf32> to vector<32x12xbf16>
    %c0_16 = arith.constant 0 : index
    %c0_17 = arith.constant 0 : index
    %12 = vector.load %arg2[%c0_16, %c0_17] : memref<12x128xbf16, #tpu.memory_space<vmem>>, vector<12x128xbf16>
    %cst_18 = arith.constant dense<0.000000e+00> : vector<32x128xf32>
    %13 = tpu.matmul %11, %12, %cst_18 {dimension_numbers = #tpu.dot_dimension_numbers<[1], [0], [0], [1], [0, 0, 1, 1], [], []>} : vector<32x12xbf16>, vector<12x128xbf16>, vector<32x128xf32> -> vector<32x128xf32>
    %14 = vector.shape_cast %13 : vector<32x128xf32> to vector<2x16x128xf32>
    %15 = vector.shape_cast %0 : vector<2x16x4xf32> to vector<32x4xf32>
    %16 = arith.truncf %15 : vector<32x4xf32> to vector<32x4xbf16>
    %c0_19 = arith.constant 0 : index
    %c0_20 = arith.constant 0 : index
    %17 = vector.load %arg3[%c0_19, %c0_20] : memref<4x128xbf16, #tpu.memory_space<vmem>>, vector<4x128xbf16>
    %cst_21 = arith.constant dense<0.000000e+00> : vector<32x128xf32>
    %18 = tpu.matmul %16, %17, %cst_21 {dimension_numbers = #tpu.dot_dimension_numbers<[1], [0], [0], [1], [0, 0, 1, 1], [], []>} : vector<32x4xbf16>, vector<4x128xbf16>, vector<32x128xf32> -> vector<32x128xf32>
    %19 = vector.shape_cast %18 : vector<32x128xf32> to vector<2x16x128xf32>
    %20 = arith.truncf %14 : vector<2x16x128xf32> to vector<2x16x128xbf16>
    %c0_22 = arith.constant 0 : index
    %c0_23 = arith.constant 0 : index
    %c0_24 = arith.constant 0 : index
    %21 = vector.load %arg4[%c0_22, %c0_23, %c0_24] : memref<2x16x128xbf16, #tpu.memory_space<vmem>>, vector<2x16x128xbf16>
    tpu.vector_store %arg4[%c0_22, %c0_23, %c0_24], %20 {strides = array<i32>} : memref<2x16x128xbf16, #tpu.memory_space<vmem>>, vector<2x16x128xbf16>,
    %c0_i32 = arith.constant 0 : i32
    %22 = arith.cmpi eq, %arg0, %c0_i32 : i32
    %23 = arith.extui %22 : i1 to i32
    %c0_i32_25 = arith.constant 0 : i32
    %24 = arith.cmpi ne, %23, %c0_i32_25 : i32
    scf.if %24 {
      %cst_46 = arith.constant 0.000000e+00 : f32
      %49 = vector.broadcast %cst_46 : f32 to vector<2x128xf32>
      %c0_47 = arith.constant 0 : index
      %c0_48 = arith.constant 0 : index
      %50 = vector.load %arg5[%c0_47, %c0_48] : memref<2x128xf32, #tpu.memory_space<vmem>>, vector<2x128xf32>
      tpu.vector_store %arg5[%c0_47, %c0_48], %49 {strides = array<i32>} : memref<2x128xf32, #tpu.memory_space<vmem>>, vector<2x128xf32>,
      %cst_49 = arith.constant 0.000000e+00 : f32
      %51 = vector.broadcast %cst_49 : f32 to vector<2x128xf32>
      %c0_50 = arith.constant 0 : index
      %c0_51 = arith.constant 0 : index
      %52 = vector.load %arg6[%c0_50, %c0_51] : memref<2x128xf32, #tpu.memory_space<vmem>>, vector<2x128xf32>
      tpu.vector_store %arg6[%c0_50, %c0_51], %51 {strides = array<i32>} : memref<2x128xf32, #tpu.memory_space<vmem>>, vector<2x128xf32>,
    } else {
    }
    %25 = vector.shape_cast %14 : vector<2x16x128xf32> to vector<32x128xf32>
    %c0_26 = arith.constant 0 : index
    %c0_27 = arith.constant 0 : index
    %26 = vector.load %arg5[%c0_26, %c0_27] : memref<2x128xf32, #tpu.memory_space<vmem>>, vector<1x128xf32>
    %cst_28 = arith.constant dense<0.000000e+00> : vector<128xf32>
    %27 = vector.multi_reduction <add>, %25, %cst_28 [0] : vector<32x128xf32> to vector<128xf32>
    %28 = vector.shape_cast %27 : vector<128xf32> to vector<1x128xf32>
    %29 = arith.addf %26, %28 : vector<1x128xf32>
    %c0_29 = arith.constant 0 : index
    %c0_30 = arith.constant 0 : index
    %30 = vector.load %arg5[%c0_29, %c0_30] : memref<2x128xf32, #tpu.memory_space<vmem>>, vector<1x128xf32>
    tpu.vector_store %arg5[%c0_29, %c0_30], %29 {strides = array<i32>} : memref<2x128xf32, #tpu.memory_space<vmem>>, vector<1x128xf32>,
    %c1_31 = arith.constant 1 : index
    %c0_32 = arith.constant 0 : index
    %31 = vector.load %arg5[%c1_31, %c0_32] : memref<2x128xf32, #tpu.memory_space<vmem>>, vector<1x128xf32>
    %32 = arith.mulf %25, %25 : vector<32x128xf32>
    %cst_33 = arith.constant dense<0.000000e+00> : vector<128xf32>
    %33 = vector.multi_reduction <add>, %32, %cst_33 [0] : vector<32x128xf32> to vector<128xf32>
    %34 = vector.shape_cast %33 : vector<128xf32> to vector<1x128xf32>
    %35 = arith.addf %31, %34 : vector<1x128xf32>
    %c1_34 = arith.constant 1 : index
    %c0_35 = arith.constant 0 : index
    %36 = vector.load %arg5[%c1_34, %c0_35] : memref<2x128xf32, #tpu.memory_space<vmem>>, vector<1x128xf32>
    tpu.vector_store %arg5[%c1_34, %c0_35], %35 {strides = array<i32>} : memref<2x128xf32, #tpu.memory_space<vmem>>, vector<1x128xf32>,
    %37 = vector.shape_cast %19 : vector<2x16x128xf32> to vector<32x128xf32>
    %c0_36 = arith.constant 0 : index
    %c0_37 = arith.constant 0 : index
    %38 = vector.load %arg6[%c0_36, %c0_37] : memref<2x128xf32, #tpu.memory_space<vmem>>, vector<1x128xf32>
    %cst_38 = arith.constant dense<0.000000e+00> : vector<128xf32>
    %39 = vector.multi_reduction <add>, %37, %cst_38 [0] : vector<32x128xf32> to vector<128xf32>
    %40 = vector.shape_cast %39 : vector<128xf32> to vector<1x128xf32>
    %41 = arith.addf %38, %40 : vector<1x128xf32>
    %c0_39 = arith.constant 0 : index
    %c0_40 = arith.constant 0 : index
    %42 = vector.load %arg6[%c0_39, %c0_40] : memref<2x128xf32, #tpu.memory_space<vmem>>, vector<1x128xf32>
    tpu.vector_store %arg6[%c0_39, %c0_40], %41 {strides = array<i32>} : memref<2x128xf32, #tpu.memory_space<vmem>>, vector<1x128xf32>,
    %c1_41 = arith.constant 1 : index
    %c0_42 = arith.constant 0 : index
    %43 = vector.load %arg6[%c1_41, %c0_42] : memref<2x128xf32, #tpu.memory_space<vmem>>, vector<1x128xf32>
    %44 = arith.mulf %37, %37 : vector<32x128xf32>
    %cst_43 = arith.constant dense<0.000000e+00> : vector<128xf32>
    %45 = vector.multi_reduction <add>, %44, %cst_43 [0] : vector<32x128xf32> to vector<128xf32>
    %46 = vector.shape_cast %45 : vector<128xf32> to vector<1x128xf32>
    %47 = arith.addf %43, %46 : vector<1x128xf32>
    %c1_44 = arith.constant 1 : index
    %c0_45 = arith.constant 0 : index
    %48 = vector.load %arg6[%c1_44, %c0_45] : memref<2x128xf32, #tpu.memory_space<vmem>>, vector<1x128xf32>
    tpu.vector_store %arg6[%c1_44, %c0_45], %47 {strides = array<i32>} : memref<2x128xf32, #tpu.memory_space<vmem>>, vector<1x128xf32>,
    return
  }
  func.func @transform_0(%arg0: i32) -> (i32, i32, i32) {
    %c0_i32 = arith.constant 0 : i32
    %c0_i32_0 = arith.constant 0 : i32
    %c0_i32_1 = arith.constant 0 : i32
    return %arg0, %c0_i32, %c0_i32_0 : i32, i32, i32
  }
  func.func @transform_1(%arg0: i32) -> (i32, i32) {
    %c0_i32 = arith.constant 0 : i32
    %c0_i32_0 = arith.constant 0 : i32
    %c0_i32_1 = arith.constant 0 : i32
    return %c0_i32, %c0_i32_0 : i32, i32
  }
  func.func @transform_2(%arg0: i32) -> (i32, i32) {
    %c0_i32 = arith.constant 0 : i32
    %c0_i32_0 = arith.constant 0 : i32
    %c0_i32_1 = arith.constant 0 : i32
    return %c0_i32, %c0_i32_0 : i32, i32
  }
  func.func @transform_3(%arg0: i32) -> (i32, i32, i32) {
    %c0_i32 = arith.constant 0 : i32
    %c0_i32_0 = arith.constant 0 : i32
    %c0_i32_1 = arith.constant 0 : i32
    return %arg0, %c0_i32, %c0_i32_0 : i32, i32, i32
  }
  func.func @transform_4(%arg0: i32) -> (i32, i32) {
    %c0_i32 = arith.constant 0 : i32
    %c0_i32_0 = arith.constant 0 : i32
    %c0_i32_1 = arith.constant 0 : i32
    return %c0_i32, %c0_i32_0 : i32, i32
  }
  func.func @transform_5(%arg0: i32) -> (i32, i32) {
    %c0_i32 = arith.constant 0 : i32
    %c0_i32_0 = arith.constant 0 : i32
    %c0_i32_1 = arith.constant 0 : i32
    return %c0_i32, %c0_i32_0 : i32, i32
  }
}

module attributes {stable_mosaic.version = 11 : i64} {
  func.func @_pass2_kernel(%arg0: i32, %arg1: memref<2x16x128xbf16, #tpu.memory_space<vmem>>, %arg2: memref<2x128xf32, #tpu.memory_space<vmem>>, %arg3: memref<1x128xf32, #tpu.memory_space<vmem>>, %arg4: memref<1x128xf32, #tpu.memory_space<vmem>>, %arg5: memref<384x128xbf16, #tpu.memory_space<vmem>>, %arg6: memref<2x16x128xbf16, #tpu.memory_space<vmem>>, %arg7: memref<2x128xf32, #tpu.memory_space<vmem>>, %arg8: memref<2x16x384xf32, #tpu.memory_space<vmem>>) attributes {dimension_semantics = [#tpu.dimension_semantics<arbitrary>], iteration_bounds = array<i64: 1>, scalar_prefetch = 0 : i64, scratch_operands = 1 : i64, tpu.core_type = #tpu.core_type<tc>, window_params = [{transform_indices = @transform_0, window_bounds = array<i64: 2, 16, 128>}, {pipeline_mode = #tpu.pipeline_mode<synchronous>, transform_indices = @transform_1, window_bounds = array<i64: 2, 128>}, {pipeline_mode = #tpu.pipeline_mode<synchronous>, transform_indices = @transform_2, window_bounds = array<i64: 1, 128>}, {pipeline_mode = #tpu.pipeline_mode<synchronous>, transform_indices = @transform_3, window_bounds = array<i64: 1, 128>}, {pipeline_mode = #tpu.pipeline_mode<synchronous>, transform_indices = @transform_4, window_bounds = array<i64: 384, 128>}, {transform_indices = @transform_5, window_bounds = array<i64: 2, 16, 128>}, {pipeline_mode = #tpu.pipeline_mode<synchronous>, transform_indices = @transform_6, window_bounds = array<i64: 2, 128>}]} {
    %c0 = arith.constant 0 : index
    %c0_0 = arith.constant 0 : index
    %0 = vector.load %arg2[%c0, %c0_0] : memref<2x128xf32, #tpu.memory_space<vmem>>, vector<1x128xf32>
    %cst = arith.constant 3.125000e-02 : f32
    %1 = vector.broadcast %cst : f32 to vector<1x128xf32>
    %2 = arith.mulf %0, %1 : vector<1x128xf32>
    %c1 = arith.constant 1 : index
    %c0_1 = arith.constant 0 : index
    %3 = vector.load %arg2[%c1, %c0_1] : memref<2x128xf32, #tpu.memory_space<vmem>>, vector<1x128xf32>
    %cst_2 = arith.constant 3.125000e-02 : f32
    %4 = vector.broadcast %cst_2 : f32 to vector<1x128xf32>
    %5 = arith.mulf %3, %4 : vector<1x128xf32>
    %6 = arith.mulf %2, %2 : vector<1x128xf32>
    %7 = arith.subf %5, %6 : vector<1x128xf32>
    %cst_3 = arith.constant 0.000000e+00 : f32
    %8 = vector.broadcast %cst_3 : f32 to vector<1x128xf32>
    %9 = arith.maximumf %7, %8 : vector<1x128xf32>
    %c0_4 = arith.constant 0 : index
    %c0_5 = arith.constant 0 : index
    %10 = vector.load %arg3[%c0_4, %c0_5] : memref<1x128xf32, #tpu.memory_space<vmem>>, vector<1x128xf32>
    %cst_6 = arith.constant 9.99999974E-6 : f32
    %11 = vector.broadcast %cst_6 : f32 to vector<1x128xf32>
    %12 = arith.addf %9, %11 : vector<1x128xf32>
    %13 = math.rsqrt %12 : vector<1x128xf32>
    %14 = arith.mulf %10, %13 : vector<1x128xf32>
    %c0_7 = arith.constant 0 : index
    %c0_8 = arith.constant 0 : index
    %15 = vector.load %arg4[%c0_7, %c0_8] : memref<1x128xf32, #tpu.memory_space<vmem>>, vector<1x128xf32>
    %16 = arith.mulf %2, %14 : vector<1x128xf32>
    %17 = arith.subf %15, %16 : vector<1x128xf32>
    %c0_9 = arith.constant 0 : index
    %c0_10 = arith.constant 0 : index
    %c0_11 = arith.constant 0 : index
    %18 = vector.load %arg1[%c0_9, %c0_10, %c0_11] : memref<2x16x128xbf16, #tpu.memory_space<vmem>>, vector<2x16x128xbf16>
    %19 = arith.extf %18 : vector<2x16x128xbf16> to vector<2x16x128xf32>
    %20 = vector.shape_cast %14 : vector<1x128xf32> to vector<1x1x128xf32>
    %21 = vector.broadcast %20 : vector<1x1x128xf32> to vector<2x16x128xf32>
    %22 = arith.mulf %19, %21 : vector<2x16x128xf32>
    %23 = vector.shape_cast %17 : vector<1x128xf32> to vector<1x1x128xf32>
    %24 = vector.broadcast %23 : vector<1x1x128xf32> to vector<2x16x128xf32>
    %25 = arith.addf %22, %24 : vector<2x16x128xf32>
    %cst_12 = arith.constant 0.000000e+00 : f32
    %26 = vector.broadcast %cst_12 : f32 to vector<2x16x128xf32>
    %27 = arith.maximumf %25, %26 : vector<2x16x128xf32>
    %28 = vector.extract_strided_slice %27 {offsets = [0, 0, 0], sizes = [2, 15, 128], strides = [1, 1, 1]} : vector<2x16x128xf32> to vector<2x15x128xf32>
    %c0_13 = arith.constant 0 : index
    %c1_14 = arith.constant 1 : index
    %c0_15 = arith.constant 0 : index
    %29 = vector.load %arg8[%c0_13, %c1_14, %c0_15] : memref<2x16x384xf32, #tpu.memory_space<vmem>>, vector<2x15x128xf32>
    tpu.vector_store %arg8[%c0_13, %c1_14, %c0_15], %28 {strides = array<i32>} : memref<2x16x384xf32, #tpu.memory_space<vmem>>, vector<2x15x128xf32>,
    %c0_16 = arith.constant 0 : index
    %c0_17 = arith.constant 0 : index
    %c128 = arith.constant 128 : index
    %30 = vector.load %arg8[%c0_16, %c0_17, %c128] : memref<2x16x384xf32, #tpu.memory_space<vmem>>, vector<2x16x128xf32>
    tpu.vector_store %arg8[%c0_16, %c0_17, %c128], %27 {strides = array<i32>} : memref<2x16x384xf32, #tpu.memory_space<vmem>>, vector<2x16x128xf32>,
    %31 = vector.extract_strided_slice %27 {offsets = [0, 1, 0], sizes = [2, 15, 128], strides = [1, 1, 1]} : vector<2x16x128xf32> to vector<2x15x128xf32>
    %c0_18 = arith.constant 0 : index
    %c0_19 = arith.constant 0 : index
    %c256 = arith.constant 256 : index
    %32 = vector.load %arg8[%c0_18, %c0_19, %c256] : memref<2x16x384xf32, #tpu.memory_space<vmem>>, vector<2x15x128xf32>
    tpu.vector_store %arg8[%c0_18, %c0_19, %c256], %31 {strides = array<i32>} : memref<2x16x384xf32, #tpu.memory_space<vmem>>, vector<2x15x128xf32>,
    %cst_20 = arith.constant 0.000000e+00 : f32
    %33 = vector.broadcast %cst_20 : f32 to vector<2x1x128xf32>
    %c0_21 = arith.constant 0 : index
    %c0_22 = arith.constant 0 : index
    %c0_23 = arith.constant 0 : index
    %34 = vector.load %arg8[%c0_21, %c0_22, %c0_23] : memref<2x16x384xf32, #tpu.memory_space<vmem>>, vector<2x1x128xf32>
    tpu.vector_store %arg8[%c0_21, %c0_22, %c0_23], %33 {strides = array<i32>} : memref<2x16x384xf32, #tpu.memory_space<vmem>>, vector<2x1x128xf32>,
    %c0_24 = arith.constant 0 : index
    %c15 = arith.constant 15 : index
    %c256_25 = arith.constant 256 : index
    %35 = vector.load %arg8[%c0_24, %c15, %c256_25] : memref<2x16x384xf32, #tpu.memory_space<vmem>>, vector<2x1x128xf32>
    tpu.vector_store %arg8[%c0_24, %c15, %c256_25], %33 {strides = array<i32>} : memref<2x16x384xf32, #tpu.memory_space<vmem>>, vector<2x1x128xf32>,
    %c0_26 = arith.constant 0 : index
    %c0_27 = arith.constant 0 : index
    %c0_28 = arith.constant 0 : index
    %36 = vector.load %arg8[%c0_26, %c0_27, %c0_28] : memref<2x16x384xf32, #tpu.memory_space<vmem>>, vector<2x16x384xf32>
    %37 = vector.shape_cast %36 : vector<2x16x384xf32> to vector<32x384xf32>
    %38 = arith.truncf %37 : vector<32x384xf32> to vector<32x384xbf16>
    %c0_29 = arith.constant 0 : index
    %c0_30 = arith.constant 0 : index
    %39 = vector.load %arg5[%c0_29, %c0_30] : memref<384x128xbf16, #tpu.memory_space<vmem>>, vector<384x128xbf16>
    %cst_31 = arith.constant dense<0.000000e+00> : vector<32x128xf32>
    %40 = tpu.matmul %38, %39, %cst_31 {dimension_numbers = #tpu.dot_dimension_numbers<[1], [0], [0], [1], [0, 0, 1, 1], [], []>} : vector<32x384xbf16>, vector<384x128xbf16>, vector<32x128xf32> -> vector<32x128xf32>
    %41 = vector.shape_cast %40 : vector<32x128xf32> to vector<2x16x128xf32>
    %42 = arith.truncf %41 : vector<2x16x128xf32> to vector<2x16x128xbf16>
    %c0_32 = arith.constant 0 : index
    %c0_33 = arith.constant 0 : index
    %c0_34 = arith.constant 0 : index
    %43 = vector.load %arg6[%c0_32, %c0_33, %c0_34] : memref<2x16x128xbf16, #tpu.memory_space<vmem>>, vector<2x16x128xbf16>
    tpu.vector_store %arg6[%c0_32, %c0_33, %c0_34], %42 {strides = array<i32>} : memref<2x16x128xbf16, #tpu.memory_space<vmem>>, vector<2x16x128xbf16>,
    %c0_i32 = arith.constant 0 : i32
    %44 = arith.cmpi eq, %arg0, %c0_i32 : i32
    %45 = arith.extui %44 : i1 to i32
    %c0_i32_35 = arith.constant 0 : i32
    %46 = arith.cmpi ne, %45, %c0_i32_35 : i32
    scf.if %46 {
      %cst_46 = arith.constant 0.000000e+00 : f32
      %59 = vector.broadcast %cst_46 : f32 to vector<2x128xf32>
      %c0_47 = arith.constant 0 : index
      %c0_48 = arith.constant 0 : index
      %60 = vector.load %arg7[%c0_47, %c0_48] : memref<2x128xf32, #tpu.memory_space<vmem>>, vector<2x128xf32>
      tpu.vector_store %arg7[%c0_47, %c0_48], %59 {strides = array<i32>} : memref<2x128xf32, #tpu.memory_space<vmem>>, vector<2x128xf32>,
    } else {
    }
    %47 = vector.shape_cast %41 : vector<2x16x128xf32> to vector<32x128xf32>
    %c0_36 = arith.constant 0 : index
    %c0_37 = arith.constant 0 : index
    %48 = vector.load %arg7[%c0_36, %c0_37] : memref<2x128xf32, #tpu.memory_space<vmem>>, vector<1x128xf32>
    %cst_38 = arith.constant dense<0.000000e+00> : vector<128xf32>
    %49 = vector.multi_reduction <add>, %47, %cst_38 [0] : vector<32x128xf32> to vector<128xf32>
    %50 = vector.shape_cast %49 : vector<128xf32> to vector<1x128xf32>
    %51 = arith.addf %48, %50 : vector<1x128xf32>
    %c0_39 = arith.constant 0 : index
    %c0_40 = arith.constant 0 : index
    %52 = vector.load %arg7[%c0_39, %c0_40] : memref<2x128xf32, #tpu.memory_space<vmem>>, vector<1x128xf32>
    tpu.vector_store %arg7[%c0_39, %c0_40], %51 {strides = array<i32>} : memref<2x128xf32, #tpu.memory_space<vmem>>, vector<1x128xf32>,
    %c1_41 = arith.constant 1 : index
    %c0_42 = arith.constant 0 : index
    %53 = vector.load %arg7[%c1_41, %c0_42] : memref<2x128xf32, #tpu.memory_space<vmem>>, vector<1x128xf32>
    %54 = arith.mulf %47, %47 : vector<32x128xf32>
    %cst_43 = arith.constant dense<0.000000e+00> : vector<128xf32>
    %55 = vector.multi_reduction <add>, %54, %cst_43 [0] : vector<32x128xf32> to vector<128xf32>
    %56 = vector.shape_cast %55 : vector<128xf32> to vector<1x128xf32>
    %57 = arith.addf %53, %56 : vector<1x128xf32>
    %c1_44 = arith.constant 1 : index
    %c0_45 = arith.constant 0 : index
    %58 = vector.load %arg7[%c1_44, %c0_45] : memref<2x128xf32, #tpu.memory_space<vmem>>, vector<1x128xf32>
    tpu.vector_store %arg7[%c1_44, %c0_45], %57 {strides = array<i32>} : memref<2x128xf32, #tpu.memory_space<vmem>>, vector<1x128xf32>,
    return
  }
  func.func @transform_0(%arg0: i32) -> (i32, i32, i32) {
    %c0_i32 = arith.constant 0 : i32
    %c0_i32_0 = arith.constant 0 : i32
    %c0_i32_1 = arith.constant 0 : i32
    return %arg0, %c0_i32, %c0_i32_0 : i32, i32, i32
  }
  func.func @transform_1(%arg0: i32) -> (i32, i32) {
    %c0_i32 = arith.constant 0 : i32
    %c0_i32_0 = arith.constant 0 : i32
    %c0_i32_1 = arith.constant 0 : i32
    return %c0_i32, %c0_i32_0 : i32, i32
  }
  func.func @transform_2(%arg0: i32) -> (i32, i32) {
    %c0_i32 = arith.constant 0 : i32
    %c0_i32_0 = arith.constant 0 : i32
    %c0_i32_1 = arith.constant 0 : i32
    return %c0_i32, %c0_i32_0 : i32, i32
  }
  func.func @transform_3(%arg0: i32) -> (i32, i32) {
    %c0_i32 = arith.constant 0 : i32
    %c0_i32_0 = arith.constant 0 : i32
    %c0_i32_1 = arith.constant 0 : i32
    return %c0_i32, %c0_i32_0 : i32, i32
  }
  func.func @transform_4(%arg0: i32) -> (i32, i32) {
    %c0_i32 = arith.constant 0 : i32
    %c0_i32_0 = arith.constant 0 : i32
    %c0_i32_1 = arith.constant 0 : i32
    return %c0_i32, %c0_i32_0 : i32, i32
  }
  func.func @transform_5(%arg0: i32) -> (i32, i32, i32) {
    %c0_i32 = arith.constant 0 : i32
    %c0_i32_0 = arith.constant 0 : i32
    %c0_i32_1 = arith.constant 0 : i32
    return %arg0, %c0_i32, %c0_i32_0 : i32, i32, i32
  }
  func.func @transform_6(%arg0: i32) -> (i32, i32) {
    %c0_i32 = arith.constant 0 : i32
    %c0_i32_0 = arith.constant 0 : i32
    %c0_i32_1 = arith.constant 0 : i32
    return %c0_i32, %c0_i32_0 : i32, i32
  }
}

module attributes {stable_mosaic.version = 11 : i64} {
  func.func @_pass3_kernel(%arg0: i32, %arg1: memref<2x16x4xf32, #tpu.memory_space<vmem>>, %arg2: memref<2x16x128xbf16, #tpu.memory_space<vmem>>, %arg3: memref<2x128xf32, #tpu.memory_space<vmem>>, %arg4: memref<1x128xf32, #tpu.memory_space<vmem>>, %arg5: memref<1x128xf32, #tpu.memory_space<vmem>>, %arg6: memref<2x128xf32, #tpu.memory_space<vmem>>, %arg7: memref<1x128xf32, #tpu.memory_space<vmem>>, %arg8: memref<1x128xf32, #tpu.memory_space<vmem>>, %arg9: memref<4x128xbf16, #tpu.memory_space<vmem>>, %arg10: memref<128x2xbf16, #tpu.memory_space<vmem>>, %arg11: memref<2x128xbf16, #tpu.memory_space<vmem>>, %arg12: memref<2x7xf32, #tpu.memory_space<smem>>, %arg13: memref<2x16x16xf32, #tpu.memory_space<vmem>>, %arg14: memref<4x22xf32, #tpu.memory_space<vmem>>) attributes {dimension_semantics = [#tpu.dimension_semantics<parallel>], iteration_bounds = array<i64: 1>, scalar_prefetch = 0 : i64, scratch_operands = 1 : i64, tpu.core_type = #tpu.core_type<tc>, window_params = [{transform_indices = @transform_0, window_bounds = array<i64: 2, 16, 4>}, {transform_indices = @transform_1, window_bounds = array<i64: 2, 16, 128>}, {pipeline_mode = #tpu.pipeline_mode<synchronous>, transform_indices = @transform_2, window_bounds = array<i64: 2, 128>}, {pipeline_mode = #tpu.pipeline_mode<synchronous>, transform_indices = @transform_3, window_bounds = array<i64: 1, 128>}, {pipeline_mode = #tpu.pipeline_mode<synchronous>, transform_indices = @transform_4, window_bounds = array<i64: 1, 128>}, {pipeline_mode = #tpu.pipeline_mode<synchronous>, transform_indices = @transform_5, window_bounds = array<i64: 2, 128>}, {pipeline_mode = #tpu.pipeline_mode<synchronous>, transform_indices = @transform_6, window_bounds = array<i64: 1, 128>}, {pipeline_mode = #tpu.pipeline_mode<synchronous>, transform_indices = @transform_7, window_bounds = array<i64: 1, 128>}, {pipeline_mode = #tpu.pipeline_mode<synchronous>, transform_indices = @transform_8, window_bounds = array<i64: 4, 128>}, {pipeline_mode = #tpu.pipeline_mode<synchronous>, transform_indices = @transform_9, window_bounds = array<i64: 128, 2>}, {pipeline_mode = #tpu.pipeline_mode<synchronous>, transform_indices = @transform_10, window_bounds = array<i64: 2, 128>}, {transform_indices = @transform_11, window_bounds = array<i64: 2, 7>}, {transform_indices = @transform_12, window_bounds = array<i64: 2, 16, 16>}]} {
    %c0 = arith.constant 0 : index
    %c0_0 = arith.constant 0 : index
    %0 = vector.load %arg3[%c0, %c0_0] : memref<2x128xf32, #tpu.memory_space<vmem>>, vector<1x128xf32>
    %cst = arith.constant 3.125000e-02 : f32
    %1 = vector.broadcast %cst : f32 to vector<1x128xf32>
    %2 = arith.mulf %0, %1 : vector<1x128xf32>
    %c1 = arith.constant 1 : index
    %c0_1 = arith.constant 0 : index
    %3 = vector.load %arg3[%c1, %c0_1] : memref<2x128xf32, #tpu.memory_space<vmem>>, vector<1x128xf32>
    %cst_2 = arith.constant 3.125000e-02 : f32
    %4 = vector.broadcast %cst_2 : f32 to vector<1x128xf32>
    %5 = arith.mulf %3, %4 : vector<1x128xf32>
    %6 = arith.mulf %2, %2 : vector<1x128xf32>
    %7 = arith.subf %5, %6 : vector<1x128xf32>
    %cst_3 = arith.constant 0.000000e+00 : f32
    %8 = vector.broadcast %cst_3 : f32 to vector<1x128xf32>
    %9 = arith.maximumf %7, %8 : vector<1x128xf32>
    %c0_4 = arith.constant 0 : index
    %c0_5 = arith.constant 0 : index
    %10 = vector.load %arg4[%c0_4, %c0_5] : memref<1x128xf32, #tpu.memory_space<vmem>>, vector<1x128xf32>
    %cst_6 = arith.constant 9.99999974E-6 : f32
    %11 = vector.broadcast %cst_6 : f32 to vector<1x128xf32>
    %12 = arith.addf %9, %11 : vector<1x128xf32>
    %13 = math.rsqrt %12 : vector<1x128xf32>
    %14 = arith.mulf %10, %13 : vector<1x128xf32>
    %c0_7 = arith.constant 0 : index
    %c0_8 = arith.constant 0 : index
    %15 = vector.load %arg5[%c0_7, %c0_8] : memref<1x128xf32, #tpu.memory_space<vmem>>, vector<1x128xf32>
    %16 = arith.mulf %2, %14 : vector<1x128xf32>
    %17 = arith.subf %15, %16 : vector<1x128xf32>
    %c0_9 = arith.constant 0 : index
    %c0_10 = arith.constant 0 : index
    %c0_11 = arith.constant 0 : index
    %18 = vector.load %arg2[%c0_9, %c0_10, %c0_11] : memref<2x16x128xbf16, #tpu.memory_space<vmem>>, vector<2x16x128xbf16>
    %19 = arith.extf %18 : vector<2x16x128xbf16> to vector<2x16x128xf32>
    %20 = vector.shape_cast %14 : vector<1x128xf32> to vector<1x1x128xf32>
    %21 = vector.broadcast %20 : vector<1x1x128xf32> to vector<2x16x128xf32>
    %22 = arith.mulf %19, %21 : vector<2x16x128xf32>
    %23 = vector.shape_cast %17 : vector<1x128xf32> to vector<1x1x128xf32>
    %24 = vector.broadcast %23 : vector<1x1x128xf32> to vector<2x16x128xf32>
    %25 = arith.addf %22, %24 : vector<2x16x128xf32>
    %cst_12 = arith.constant dense<0.000000e+00> : vector<2x128xf32>
    %26 = vector.multi_reduction <add>, %25, %cst_12 [1] : vector<2x16x128xf32> to vector<2x128xf32>
    %cst_13 = arith.constant 1.600000e+01 : f32
    %27 = vector.broadcast %cst_13 : f32 to vector<2x128xf32>
    %28 = arith.divf %26, %27 : vector<2x128xf32>
    %cst_14 = arith.constant dense<0xFF800000> : vector<2x128xf32>
    %29 = vector.multi_reduction <maximumf>, %25, %cst_14 [1] : vector<2x16x128xf32> to vector<2x128xf32>
    %30 = tpu.concatenate %28, %29 in 0 : vector<2x128xf32>, vector<2x128xf32> -> vector<4x128xf32>
    %31 = arith.truncf %30 : vector<4x128xf32> to vector<4x128xbf16>
    %c0_15 = arith.constant 0 : index
    %c0_16 = arith.constant 0 : index
    %32 = vector.load %arg10[%c0_15, %c0_16] : memref<128x2xbf16, #tpu.memory_space<vmem>>, vector<128x2xbf16>
    %cst_17 = arith.constant dense<0.000000e+00> : vector<4x2xf32>
    %33 = tpu.matmul %31, %32, %cst_17 {dimension_numbers = #tpu.dot_dimension_numbers<[1], [0], [0], [1], [0, 0, 1, 1], [], []>} : vector<4x128xbf16>, vector<128x2xbf16>, vector<4x2xf32> -> vector<4x2xf32>
    %cst_18 = arith.constant 0.000000e+00 : f32
    %34 = vector.broadcast %cst_18 : f32 to vector<4x2xf32>
    %35 = arith.maximumf %33, %34 : vector<4x2xf32>
    %36 = arith.truncf %35 : vector<4x2xf32> to vector<4x2xbf16>
    %c0_19 = arith.constant 0 : index
    %c0_20 = arith.constant 0 : index
    %37 = vector.load %arg11[%c0_19, %c0_20] : memref<2x128xbf16, #tpu.memory_space<vmem>>, vector<2x128xbf16>
    %cst_21 = arith.constant dense<0.000000e+00> : vector<4x128xf32>
    %38 = tpu.matmul %36, %37, %cst_21 {dimension_numbers = #tpu.dot_dimension_numbers<[1], [0], [0], [1], [0, 0, 1, 1], [], []>} : vector<4x2xbf16>, vector<2x128xbf16>, vector<4x128xf32> -> vector<4x128xf32>
    %39 = vector.extract_strided_slice %38 {offsets = [0, 0], sizes = [2, 128], strides = [1, 1]} : vector<4x128xf32> to vector<2x128xf32>
    %40 = vector.extract_strided_slice %38 {offsets = [2, 0], sizes = [2, 128], strides = [1, 1]} : vector<4x128xf32> to vector<2x128xf32>
    %41 = arith.addf %39, %40 : vector<2x128xf32>
    %cst_22 = arith.constant 5.000000e-01 : f32
    %42 = vector.broadcast %cst_22 : f32 to vector<2x128xf32>
    %43 = arith.mulf %42, %41 : vector<2x128xf32>
    %44 = math.tanh %43 : vector<2x128xf32>
    %cst_23 = arith.constant 1.000000e+00 : f32
    %45 = vector.broadcast %cst_23 : f32 to vector<2x128xf32>
    %46 = arith.addf %44, %45 : vector<2x128xf32>
    %cst_24 = arith.constant 5.000000e-01 : f32
    %47 = vector.broadcast %cst_24 : f32 to vector<2x128xf32>
    %48 = arith.mulf %47, %46 : vector<2x128xf32>
    %49 = vector.shape_cast %48 : vector<2x128xf32> to vector<2x1x128xf32>
    %50 = vector.broadcast %49 : vector<2x1x128xf32> to vector<2x16x128xf32>
    %51 = arith.mulf %25, %50 : vector<2x16x128xf32>
    %52 = tpu.iota {dimensions = array<i32: 2>} : vector<1x1x128xi32>
    %c16_i32 = arith.constant 16 : i32
    %53 = vector.broadcast %c16_i32 : i32 to vector<1x1x128xi32>
    %54 = arith.cmpi slt, %52, %53 : vector<1x1x128xi32>
    %cst_25 = arith.constant 0.000000e+00 : f32
    %55 = vector.broadcast %cst_25 : f32 to vector<4x3xf32>
    %c0_26 = arith.constant 0 : index
    %c0_27 = arith.constant 0 : index
    %56 = vector.load %arg14[%c0_26, %c0_27] : memref<4x22xf32, #tpu.memory_space<vmem>>, vector<4x3xf32>
    tpu.vector_store %arg14[%c0_26, %c0_27], %55 {strides = array<i32>} : memref<4x22xf32, #tpu.memory_space<vmem>>, vector<4x3xf32>,
    %c0_28 = arith.constant 0 : index
    %c19 = arith.constant 19 : index
    %57 = vector.load %arg14[%c0_28, %c19] : memref<4x22xf32, #tpu.memory_space<vmem>>, vector<4x3xf32>
    tpu.vector_store %arg14[%c0_28, %c19], %55 {strides = array<i32>} : memref<4x22xf32, #tpu.memory_space<vmem>>, vector<4x3xf32>,
    %cst_29 = arith.constant dense<0.000000e+00> : vector<2x16xf32>
    %58 = vector.multi_reduction <add>, %51, %cst_29 [2] : vector<2x16x128xf32> to vector<2x16xf32>
    %cst_30 = arith.constant 6.250000e-02 : f32
    %59 = vector.broadcast %cst_30 : f32 to vector<2x16xf32>
    %60 = arith.mulf %58, %59 : vector<2x16xf32>
    %c0_31 = arith.constant 0 : index
    %c3 = arith.constant 3 : index
    %61 = vector.load %arg14[%c0_31, %c3] : memref<4x22xf32, #tpu.memory_space<vmem>>, vector<2x16xf32>
    tpu.vector_store %arg14[%c0_31, %c3], %60 {strides = array<i32>} : memref<4x22xf32, #tpu.memory_space<vmem>>, vector<2x16xf32>,
    %cst_32 = arith.constant -1.000000e+30 : f32
    %62 = vector.shape_cast %54 : vector<1x1x128xi1> to vector<1x1x128xi1>
    %63 = vector.broadcast %62 : vector<1x1x128xi1> to vector<2x16x128xi1>
    %64 = vector.broadcast %cst_32 : f32 to vector<2x16x128xf32>
    %65 = arith.select %63, %51, %64 : vector<2x16x128xi1>, vector<2x16x128xf32>
    %cst_33 = arith.constant dense<0xFF800000> : vector<2x16xf32>
    %66 = vector.multi_reduction <maximumf>, %65, %cst_33 [2] : vector<2x16x128xf32> to vector<2x16xf32>
    %c2 = arith.constant 2 : index
    %c3_34 = arith.constant 3 : index
    %67 = vector.load %arg14[%c2, %c3_34] : memref<4x22xf32, #tpu.memory_space<vmem>>, vector<2x16xf32>
    tpu.vector_store %arg14[%c2, %c3_34], %66 {strides = array<i32>} : memref<4x22xf32, #tpu.memory_space<vmem>>, vector<2x16xf32>,
    %cst_35 = arith.constant 0.000000e+00 : f32
    %68 = vector.broadcast %cst_35 : f32 to vector<2x16xf32>
    %c0_36 = arith.constant 0 : index
    %c0_37 = arith.constant 0 : index
    %69 = memref.load %arg12[%c0_36, %c0_37] : memref<2x7xf32, #tpu.memory_space<smem>>
    %c0_38 = arith.constant 0 : index
    %c0_39 = arith.constant 0 : index
    %70 = vector.load %arg14[%c0_38, %c0_39] : memref<4x22xf32, #tpu.memory_space<vmem>>, vector<2x16xf32>
    %71 = vector.broadcast %69 : f32 to vector<2x16xf32>
    %72 = arith.mulf %71, %70 : vector<2x16xf32>
    %73 = arith.addf %68, %72 : vector<2x16xf32>
    %c1_40 = arith.constant 1 : index
    %c0_41 = arith.constant 0 : index
    %74 = memref.load %arg12[%c1_40, %c0_41] : memref<2x7xf32, #tpu.memory_space<smem>>
    %c2_42 = arith.constant 2 : index
    %c0_43 = arith.constant 0 : index
    %75 = vector.load %arg14[%c2_42, %c0_43] : memref<4x22xf32, #tpu.memory_space<vmem>>, vector<2x16xf32>
    %76 = vector.broadcast %74 : f32 to vector<2x16xf32>
    %77 = arith.mulf %76, %75 : vector<2x16xf32>
    %78 = arith.addf %73, %77 : vector<2x16xf32>
    %c0_44 = arith.constant 0 : index
    %c1_45 = arith.constant 1 : index
    %79 = memref.load %arg12[%c0_44, %c1_45] : memref<2x7xf32, #tpu.memory_space<smem>>
    %c0_46 = arith.constant 0 : index
    %c1_47 = arith.constant 1 : index
    %80 = vector.load %arg14[%c0_46, %c1_47] : memref<4x22xf32, #tpu.memory_space<vmem>>, vector<2x16xf32>
    %81 = vector.broadcast %79 : f32 to vector<2x16xf32>
    %82 = arith.mulf %81, %80 : vector<2x16xf32>
    %83 = arith.addf %78, %82 : vector<2x16xf32>
    %c1_48 = arith.constant 1 : index
    %c1_49 = arith.constant 1 : index
    %84 = memref.load %arg12[%c1_48, %c1_49] : memref<2x7xf32, #tpu.memory_space<smem>>
    %c2_50 = arith.constant 2 : index
    %c1_51 = arith.constant 1 : index
    %85 = vector.load %arg14[%c2_50, %c1_51] : memref<4x22xf32, #tpu.memory_space<vmem>>, vector<2x16xf32>
    %86 = vector.broadcast %84 : f32 to vector<2x16xf32>
    %87 = arith.mulf %86, %85 : vector<2x16xf32>
    %88 = arith.addf %83, %87 : vector<2x16xf32>
    %c0_52 = arith.constant 0 : index
    %c2_53 = arith.constant 2 : index
    %89 = memref.load %arg12[%c0_52, %c2_53] : memref<2x7xf32, #tpu.memory_space<smem>>
    %c0_54 = arith.constant 0 : index
    %c2_55 = arith.constant 2 : index
    %90 = vector.load %arg14[%c0_54, %c2_55] : memref<4x22xf32, #tpu.memory_space<vmem>>, vector<2x16xf32>
    %91 = vector.broadcast %89 : f32 to vector<2x16xf32>
    %92 = arith.mulf %91, %90 : vector<2x16xf32>
    %93 = arith.addf %88, %92 : vector<2x16xf32>
    %c1_56 = arith.constant 1 : index
    %c2_57 = arith.constant 2 : index
    %94 = memref.load %arg12[%c1_56, %c2_57] : memref<2x7xf32, #tpu.memory_space<smem>>
    %c2_58 = arith.constant 2 : index
    %c2_59 = arith.constant 2 : index
    %95 = vector.load %arg14[%c2_58, %c2_59] : memref<4x22xf32, #tpu.memory_space<vmem>>, vector<2x16xf32>
    %96 = vector.broadcast %94 : f32 to vector<2x16xf32>
    %97 = arith.mulf %96, %95 : vector<2x16xf32>
    %98 = arith.addf %93, %97 : vector<2x16xf32>
    %c0_60 = arith.constant 0 : index
    %c3_61 = arith.constant 3 : index
    %99 = memref.load %arg12[%c0_60, %c3_61] : memref<2x7xf32, #tpu.memory_space<smem>>
    %c0_62 = arith.constant 0 : index
    %c3_63 = arith.constant 3 : index
    %100 = vector.load %arg14[%c0_62, %c3_63] : memref<4x22xf32, #tpu.memory_space<vmem>>, vector<2x16xf32>
    %101 = vector.broadcast %99 : f32 to vector<2x16xf32>
    %102 = arith.mulf %101, %100 : vector<2x16xf32>
    %103 = arith.addf %98, %102 : vector<2x16xf32>
    %c1_64 = arith.constant 1 : index
    %c3_65 = arith.constant 3 : index
    %104 = memref.load %arg12[%c1_64, %c3_65] : memref<2x7xf32, #tpu.memory_space<smem>>
    %c2_66 = arith.constant 2 : index
    %c3_67 = arith.constant 3 : index
    %105 = vector.load %arg14[%c2_66, %c3_67] : memref<4x22xf32, #tpu.memory_space<vmem>>, vector<2x16xf32>
    %106 = vector.broadcast %104 : f32 to vector<2x16xf32>
    %107 = arith.mulf %106, %105 : vector<2x16xf32>
    %108 = arith.addf %103, %107 : vector<2x16xf32>
    %c0_68 = arith.constant 0 : index
    %c4 = arith.constant 4 : index
    %109 = memref.load %arg12[%c0_68, %c4] : memref<2x7xf32, #tpu.memory_space<smem>>
    %c0_69 = arith.constant 0 : index
    %c4_70 = arith.constant 4 : index
    %110 = vector.load %arg14[%c0_69, %c4_70] : memref<4x22xf32, #tpu.memory_space<vmem>>, vector<2x16xf32>
    %111 = vector.broadcast %109 : f32 to vector<2x16xf32>
    %112 = arith.mulf %111, %110 : vector<2x16xf32>
    %113 = arith.addf %108, %112 : vector<2x16xf32>
    %c1_71 = arith.constant 1 : index
    %c4_72 = arith.constant 4 : index
    %114 = memref.load %arg12[%c1_71, %c4_72] : memref<2x7xf32, #tpu.memory_space<smem>>
    %c2_73 = arith.constant 2 : index
    %c4_74 = arith.constant 4 : index
    %115 = vector.load %arg14[%c2_73, %c4_74] : memref<4x22xf32, #tpu.memory_space<vmem>>, vector<2x16xf32>
    %116 = vector.broadcast %114 : f32 to vector<2x16xf32>
    %117 = arith.mulf %116, %115 : vector<2x16xf32>
    %118 = arith.addf %113, %117 : vector<2x16xf32>
    %c0_75 = arith.constant 0 : index
    %c5 = arith.constant 5 : index
    %119 = memref.load %arg12[%c0_75, %c5] : memref<2x7xf32, #tpu.memory_space<smem>>
    %c0_76 = arith.constant 0 : index
    %c5_77 = arith.constant 5 : index
    %120 = vector.load %arg14[%c0_76, %c5_77] : memref<4x22xf32, #tpu.memory_space<vmem>>, vector<2x16xf32>
    %121 = vector.broadcast %119 : f32 to vector<2x16xf32>
    %122 = arith.mulf %121, %120 : vector<2x16xf32>
    %123 = arith.addf %118, %122 : vector<2x16xf32>
    %c1_78 = arith.constant 1 : index
    %c5_79 = arith.constant 5 : index
    %124 = memref.load %arg12[%c1_78, %c5_79] : memref<2x7xf32, #tpu.memory_space<smem>>
    %c2_80 = arith.constant 2 : index
    %c5_81 = arith.constant 5 : index
    %125 = vector.load %arg14[%c2_80, %c5_81] : memref<4x22xf32, #tpu.memory_space<vmem>>, vector<2x16xf32>
    %126 = vector.broadcast %124 : f32 to vector<2x16xf32>
    %127 = arith.mulf %126, %125 : vector<2x16xf32>
    %128 = arith.addf %123, %127 : vector<2x16xf32>
    %c0_82 = arith.constant 0 : index
    %c6 = arith.constant 6 : index
    %129 = memref.load %arg12[%c0_82, %c6] : memref<2x7xf32, #tpu.memory_space<smem>>
    %c0_83 = arith.constant 0 : index
    %c6_84 = arith.constant 6 : index
    %130 = vector.load %arg14[%c0_83, %c6_84] : memref<4x22xf32, #tpu.memory_space<vmem>>, vector<2x16xf32>
    %131 = vector.broadcast %129 : f32 to vector<2x16xf32>
    %132 = arith.mulf %131, %130 : vector<2x16xf32>
    %133 = arith.addf %128, %132 : vector<2x16xf32>
    %c1_85 = arith.constant 1 : index
    %c6_86 = arith.constant 6 : index
    %134 = memref.load %arg12[%c1_85, %c6_86] : memref<2x7xf32, #tpu.memory_space<smem>>
    %c2_87 = arith.constant 2 : index
    %c6_88 = arith.constant 6 : index
    %135 = vector.load %arg14[%c2_87, %c6_88] : memref<4x22xf32, #tpu.memory_space<vmem>>, vector<2x16xf32>
    %136 = vector.broadcast %134 : f32 to vector<2x16xf32>
    %137 = arith.mulf %136, %135 : vector<2x16xf32>
    %138 = arith.addf %133, %137 : vector<2x16xf32>
    %cst_89 = arith.constant 5.000000e-01 : f32
    %139 = vector.broadcast %cst_89 : f32 to vector<2x16xf32>
    %140 = arith.mulf %139, %138 : vector<2x16xf32>
    %141 = math.tanh %140 : vector<2x16xf32>
    %cst_90 = arith.constant 1.000000e+00 : f32
    %142 = vector.broadcast %cst_90 : f32 to vector<2x16xf32>
    %143 = arith.addf %141, %142 : vector<2x16xf32>
    %cst_91 = arith.constant 5.000000e-01 : f32
    %144 = vector.broadcast %cst_91 : f32 to vector<2x16xf32>
    %145 = arith.mulf %144, %143 : vector<2x16xf32>
    %146 = vector.shape_cast %145 : vector<2x16xf32> to vector<2x16x1xf32>
    %147 = vector.broadcast %146 : vector<2x16x1xf32> to vector<2x16x128xf32>
    %148 = arith.mulf %51, %147 : vector<2x16x128xf32>
    %c0_92 = arith.constant 0 : index
    %c0_93 = arith.constant 0 : index
    %c0_94 = arith.constant 0 : index
    %149 = vector.load %arg1[%c0_92, %c0_93, %c0_94] : memref<2x16x4xf32, #tpu.memory_space<vmem>>, vector<2x16x4xf32>
    %150 = vector.shape_cast %149 : vector<2x16x4xf32> to vector<32x4xf32>
    %151 = arith.truncf %150 : vector<32x4xf32> to vector<32x4xbf16>
    %c0_95 = arith.constant 0 : index
    %c0_96 = arith.constant 0 : index
    %152 = vector.load %arg9[%c0_95, %c0_96] : memref<4x128xbf16, #tpu.memory_space<vmem>>, vector<4x128xbf16>
    %cst_97 = arith.constant dense<0.000000e+00> : vector<32x128xf32>
    %153 = tpu.matmul %151, %152, %cst_97 {dimension_numbers = #tpu.dot_dimension_numbers<[1], [0], [0], [1], [0, 0, 1, 1], [], []>} : vector<32x4xbf16>, vector<4x128xbf16>, vector<32x128xf32> -> vector<32x128xf32>
    %154 = vector.shape_cast %153 : vector<32x128xf32> to vector<2x16x128xf32>
    %c0_98 = arith.constant 0 : index
    %c0_99 = arith.constant 0 : index
    %155 = vector.load %arg6[%c0_98, %c0_99] : memref<2x128xf32, #tpu.memory_space<vmem>>, vector<1x128xf32>
    %cst_100 = arith.constant 3.125000e-02 : f32
    %156 = vector.broadcast %cst_100 : f32 to vector<1x128xf32>
    %157 = arith.mulf %155, %156 : vector<1x128xf32>
    %c1_101 = arith.constant 1 : index
    %c0_102 = arith.constant 0 : index
    %158 = vector.load %arg6[%c1_101, %c0_102] : memref<2x128xf32, #tpu.memory_space<vmem>>, vector<1x128xf32>
    %cst_103 = arith.constant 3.125000e-02 : f32
    %159 = vector.broadcast %cst_103 : f32 to vector<1x128xf32>
    %160 = arith.mulf %158, %159 : vector<1x128xf32>
    %161 = arith.mulf %157, %157 : vector<1x128xf32>
    %162 = arith.subf %160, %161 : vector<1x128xf32>
    %cst_104 = arith.constant 0.000000e+00 : f32
    %163 = vector.broadcast %cst_104 : f32 to vector<1x128xf32>
    %164 = arith.maximumf %162, %163 : vector<1x128xf32>
    %c0_105 = arith.constant 0 : index
    %c0_106 = arith.constant 0 : index
    %165 = vector.load %arg7[%c0_105, %c0_106] : memref<1x128xf32, #tpu.memory_space<vmem>>, vector<1x128xf32>
    %cst_107 = arith.constant 9.99999974E-6 : f32
    %166 = vector.broadcast %cst_107 : f32 to vector<1x128xf32>
    %167 = arith.addf %164, %166 : vector<1x128xf32>
    %168 = math.rsqrt %167 : vector<1x128xf32>
    %169 = arith.mulf %165, %168 : vector<1x128xf32>
    %c0_108 = arith.constant 0 : index
    %c0_109 = arith.constant 0 : index
    %170 = vector.load %arg8[%c0_108, %c0_109] : memref<1x128xf32, #tpu.memory_space<vmem>>, vector<1x128xf32>
    %171 = arith.mulf %157, %169 : vector<1x128xf32>
    %172 = arith.subf %170, %171 : vector<1x128xf32>
    %173 = vector.shape_cast %169 : vector<1x128xf32> to vector<1x1x128xf32>
    %174 = vector.broadcast %173 : vector<1x1x128xf32> to vector<2x16x128xf32>
    %175 = arith.mulf %154, %174 : vector<2x16x128xf32>
    %176 = arith.addf %148, %175 : vector<2x16x128xf32>
    %177 = vector.shape_cast %172 : vector<1x128xf32> to vector<1x1x128xf32>
    %178 = vector.broadcast %177 : vector<1x1x128xf32> to vector<2x16x128xf32>
    %179 = arith.addf %176, %178 : vector<2x16x128xf32>
    %cst_110 = arith.constant 0.000000e+00 : f32
    %180 = vector.broadcast %cst_110 : f32 to vector<2x16x128xf32>
    %181 = arith.maximumf %179, %180 : vector<2x16x128xf32>
    %182 = vector.extract_strided_slice %181 {offsets = [0, 0, 0], sizes = [2, 16, 16], strides = [1, 1, 1]} : vector<2x16x128xf32> to vector<2x16x16xf32>
    %c0_111 = arith.constant 0 : index
    %c0_112 = arith.constant 0 : index
    %c0_113 = arith.constant 0 : index
    %183 = vector.load %arg13[%c0_111, %c0_112, %c0_113] : memref<2x16x16xf32, #tpu.memory_space<vmem>>, vector<2x16x16xf32>
    tpu.vector_store %arg13[%c0_111, %c0_112, %c0_113], %182 {strides = array<i32>} : memref<2x16x16xf32, #tpu.memory_space<vmem>>, vector<2x16x16xf32>,
    return
  }
  func.func @transform_0(%arg0: i32) -> (i32, i32, i32) {
    %c0_i32 = arith.constant 0 : i32
    %c0_i32_0 = arith.constant 0 : i32
    %c0_i32_1 = arith.constant 0 : i32
    return %arg0, %c0_i32, %c0_i32_0 : i32, i32, i32
  }
  func.func @transform_1(%arg0: i32) -> (i32, i32, i32) {
    %c0_i32 = arith.constant 0 : i32
    %c0_i32_0 = arith.constant 0 : i32
    %c0_i32_1 = arith.constant 0 : i32
    return %arg0, %c0_i32, %c0_i32_0 : i32, i32, i32
  }
  func.func @transform_2(%arg0: i32) -> (i32, i32) {
    %c0_i32 = arith.constant 0 : i32
    %c0_i32_0 = arith.constant 0 : i32
    %c0_i32_1 = arith.constant 0 : i32
    return %c0_i32, %c0_i32_0 : i32, i32
  }
  func.func @transform_3(%arg0: i32) -> (i32, i32) {
    %c0_i32 = arith.constant 0 : i32
    %c0_i32_0 = arith.constant 0 : i32
    %c0_i32_1 = arith.constant 0 : i32
    return %c0_i32, %c0_i32_0 : i32, i32
  }
  func.func @transform_4(%arg0: i32) -> (i32, i32) {
    %c0_i32 = arith.constant 0 : i32
    %c0_i32_0 = arith.constant 0 : i32
    %c0_i32_1 = arith.constant 0 : i32
    return %c0_i32, %c0_i32_0 : i32, i32
  }
  func.func @transform_5(%arg0: i32) -> (i32, i32) {
    %c0_i32 = arith.constant 0 : i32
    %c0_i32_0 = arith.constant 0 : i32
    %c0_i32_1 = arith.constant 0 : i32
    return %c0_i32, %c0_i32_0 : i32, i32
  }
  func.func @transform_6(%arg0: i32) -> (i32, i32) {
    %c0_i32 = arith.constant 0 : i32
    %c0_i32_0 = arith.constant 0 : i32
    %c0_i32_1 = arith.constant 0 : i32
    return %c0_i32, %c0_i32_0 : i32, i32
  }
  func.func @transform_7(%arg0: i32) -> (i32, i32) {
    %c0_i32 = arith.constant 0 : i32
    %c0_i32_0 = arith.constant 0 : i32
    %c0_i32_1 = arith.constant 0 : i32
    return %c0_i32, %c0_i32_0 : i32, i32
  }
  func.func @transform_8(%arg0: i32) -> (i32, i32) {
    %c0_i32 = arith.constant 0 : i32
    %c0_i32_0 = arith.constant 0 : i32
    %c0_i32_1 = arith.constant 0 : i32
    return %c0_i32, %c0_i32_0 : i32, i32
  }
  func.func @transform_9(%arg0: i32) -> (i32, i32) {
    %c0_i32 = arith.constant 0 : i32
    %c0_i32_0 = arith.constant 0 : i32
    %c0_i32_1 = arith.constant 0 : i32
    return %c0_i32, %c0_i32_0 : i32, i32
  }
  func.func @transform_10(%arg0: i32) -> (i32, i32) {
    %c0_i32 = arith.constant 0 : i32
    %c0_i32_0 = arith.constant 0 : i32
    %c0_i32_1 = arith.constant 0 : i32
    return %c0_i32, %c0_i32_0 : i32, i32
  }
  func.func @transform_11(%arg0: i32) -> (i32, i32) {
    %c0_i32 = arith.constant 0 : i32
    %c0_i32_0 = arith.constant 0 : i32
    %c0_i32_1 = arith.constant 0 : i32
    return %c0_i32, %c0_i32_0 : i32, i32
  }
  func.func @transform_12(%arg0: i32) -> (i32, i32, i32) {
    %c0_i32 = arith.constant 0 : i32
    %c0_i32_0 = arith.constant 0 : i32
    %c0_i32_1 = arith.constant 0 : i32
    return %arg0, %c0_i32, %c0_i32_0 : i32, i32, i32
  }
}

</mosaic_0001>

<bundles_post_ra>
// kernel: residual_cbam_forward.3
= control target key start
LH: loop header
LB: loop body
LE: loop exit
PB: predicated region body
PF: predicated region fallthrough
CT: control target
= control target key end

     0   :  { %vm22_vm0 = vcmask 31744   ;;  %vm24_vm1 = vcmask 30720   ;;  %s350_s24 = smov 4   ;;  %vm155_vm2 = vcmask 1041408   ;;  %s351_s29 = smov 8   ;;  %vm93_vm3 = vcmask 1045504   ;;  %s449_s0 = inlined_call_operand.vmem [shape: f32[2,16,4], index: 0, kind: input, shape index: {}]   ;;  %s450_s2 = inlined_call_operand.vmem [shape: bf16[4,128], index: 2, kind: input, shape index: {}]   ;;  %s451_s1 = inlined_call_operand.vmem [shape: bf16[12,128], index: 1, kind: input, shape index: {}]   ;;  %s452_s5 = inlined_call_operand.vmem [shape: f32[2,128], index: 5, kind: output, shape index: {2}]   ;;  %s453_s4 = inlined_call_operand.vmem [shape: f32[2,128], index: 4, kind: output, shape index: {1}]   ;;  %s454_s3 = inlined_call_operand.vmem [shape: bf16[2,16,128], index: 3, kind: output, shape index: {0}]  }
   0x1   :  { %v20_v0 = vld [vmem:[%s449_s0 + $0x10] sm:$0xff]  ;;  %v18_v1 = vld [vmem:[%s449_s0] sm:$0xff]  ;;  %v19_v2 = vld [vmem:[%s449_s0 + $0x8] sm:$0xff]  ;;  %v352_v10 = vmov 0.0   ;;  %vm44_vm4 = vcmask 64544   ;;  %vm61_vm5 = vcmask 97345  }
   0x2   :  { %36 = vrot.lane.b32.xlu1 %v20_v0, %s350_s24  ;;  %32 = vrot.lane.b32.xlu0 %v18_v1, %s350_s24  ;;  %v21_v3 = vld [vmem:[%s449_s0 + $0x18] sm:$0xff]  ;;  %26 = vst.msk [vmem:[#allocation2 + $0x11] sm:$0xff] %vm22_vm0, %v20_v0  ;;  %23 = vst.msk [vmem:[#allocation2 + $0x1] sm:$0xff] %vm22_vm0, %v18_v1  ;;  %v148_v4 = vld [vmem:[%s450_s2] sm:$0x3]  ;;  %v146_v5 = vpack.c.bf16 %v19_v2, %v18_v1  ;;  %vm67_vm6 = vcmask 24576  }
   0x3   :  { %25 = vst.msk [vmem:[#allocation2 + $0x9] sm:$0x7f] %vm24_vm1, %v19_v2  ;;  %27 = vst.msk [vmem:[#allocation2 + $0x19] sm:$0x7f] %vm24_vm1, %v21_v3  ;;  %345 = vmatprep.subr.msk.bf16.mxu1 %vm155_vm2, %v148_v4  ;;  %v157_v6 = vsel %vm155_vm2, %v148_v4, 0  ;;  %v147_v7 = vpack.c.bf16 %v21_v3, %v20_v0  ;;  %vm70_vm7 = vcmask 90176  }
   0x4   :  { %339 = vmatpush3.bf16.msra.mxu1 %v157_v6  ;;  %340 = vmatprep.mubr.msk.bf16.mxu1 %vm22_vm0, %v146_v5  ;;  %v349_v8 = vld [vmem:[%s451_s1] sm:$0x3f]   ;;  %233 = vst [vmem:[%s452_s5] sm:$0x3] %v352_v10  ;;  %vm63_vm8 = vcmask 97344   ;;  %vm86_vm9 = vcmask 97280   ;;  %232 = vst [vmem:[%s453_s4] sm:$0x3] %v352_v10 }
   0x5   :  { %344 = vmatprep.subr.msk.bf16.mxu0 %vm93_vm3, %v349_v8  ;;  %v95_v9 = vsel %vm93_vm3, %v349_v8, 0 }
   0x6   :  { %49 = vrot.lane.b32.xlu1 %v18_v1, %s351_s29  ;;  %34 = vrot.lane.b32.xlu0 %v19_v2, %s350_s24 }
   0x7   :  { %341 = vmatmul.mubr.msk.bf16.vlgmr.msra.gmra.mrb[0].mxu1 %vm22_vm0, %v147_v7  ;;  %333 = vmatpush3.bf16.msra.mxu0 %v95_v9 }
   0xa   :  { %51 = vrot.lane.b32.xlu1 %v19_v2, %s351_s29  ;;  %38 = vrot.lane.b32.xlu0 %v21_v3, %s350_s24 }
   0xb   :  { %v262_v48 = vld [vmem:[%s452_s5] sm:$0x1]  ;;  %v274_v51 = vld [vmem:[%s452_s5 + $0x1] sm:$0x1] }
   0xe   :  { %53 = vrot.lane.b32.xlu0 %v20_v0, %s351_s29  ;;  %55 = vrot.lane.b32.xlu1 %v21_v3, %s351_s29 }
  0x74   :  { %v37_v11 = vpop.permute.xlu1 %36  ;;  %v33_v12 = vpop.permute.xlu0 %32 }
  0x75   :  { %47 = vst.msk [vmem:[#allocation2 + $0x10] sm:$0xff] %vm44_vm4, %v37_v11  ;;  %45 = vst.msk [vmem:[#allocation2] sm:$0xff] %vm44_vm4, %v33_v12 }
  0x78   :  { %v50_v13 = vpop.permute.xlu1 %49  ;;  %v35_v14 = vpop.permute.xlu0 %34 }
  0x79   :  { %62 = vst.msk [vmem:[#allocation2 - $0x1] sm:$0xfe] %vm61_vm5, %v50_v13 }
  0x7a   :  { %46 = vst.msk [vmem:[#allocation2 + $0x8] sm:$0xff] %vm44_vm4, %v35_v14 }
  0x7b   :  { %68 = vst.msk [vmem:[#allocation2] sm:$0x1] %vm67_vm6, %v352_v10 }
  0x7c   :  { %71 = vst.msk [vmem:[#allocation2 + $0xf] sm:$0x1] %vm70_vm7, %v352_v10  ;;  %v52_v15 = vpop.permute.xlu1 %51  ;;  %v39_v16 = vpop.permute.xlu0 %38 }
  0x7d   :  { %64 = vst.msk [vmem:[#allocation2 + $0x7] sm:$0xff] %vm63_vm8, %v52_v15 }
  0x7e   :  { %48 = vst.msk [vmem:[#allocation2 + $0x18] sm:$0xff] %vm44_vm4, %v39_v16  ;;  %v234_v16 = vld [vmem:[%s453_s4] sm:$0x1] }
  0x7f   :  { %72 = vst.msk [vmem:[#allocation2 + $0x1f] sm:$0x1] %vm70_vm7, %v352_v10 }
  0x80   :  { %v54_v17 = vpop.permute.xlu0 %53  ;;  %v56_v18 = vpop.permute.xlu1 %55 }
  0x81   :  { %65 = vst.msk [vmem:[#allocation2 + $0xf] sm:$0xfe] %vm61_vm5, %v54_v17 }
  0x82   :  { %66 = vst.msk [vmem:[#allocation2 + $0x17] sm:$0xff] %vm63_vm8, %v56_v18 }
  0x83   :  { %69 = vst.msk [vmem:[#allocation2 + $0x10] sm:$0x1] %vm67_vm6, %v352_v10 }
  0x84   :  { %v73_v19 = vld [vmem:[#allocation2] sm:$0xff]  ;;  %v74_v20 = vld [vmem:[#allocation2 + $0x8] sm:$0xff] }
  0x85   :  { %v77_v21 = vpack.c.bf16 %v74_v20, %v73_v19  ;;  %v246_v19 = vld [vmem:[%s453_s4 + $0x1] sm:$0x1] }
  0x87   :  { %334 = vmatprep.mubr.msk.bf16.mxu0 %vm86_vm9, %v77_v21 }
  0x89   :  { %v76_v22 = vld [vmem:[#allocation2 + $0x18] sm:$0xff] }
  0x8a   :  { %v75_v23 = vld [vmem:[#allocation2 + $0x10] sm:$0xff] }
  0x8b   :  { %v78_v24 = vpack.c.bf16 %v76_v22, %v75_v23 }
  0x8d   :  { %335 = vmatmul.mubr.msk.bf16.vlgmr.msra.gmra.mrb[0].mxu0 %vm86_vm9, %v78_v24 }
  0xda   :  { %v342_v25 = vpop.f32.mrb[0].mxu1 }
  0xdb   :  { %v193_v26 = vpop.f32.mrb[1].mxu1  ;;  %v277_v30 = vmul.f32 %v342_v25, %v342_v25 }
  0xdc   :  { %v275_v27 = vmul.f32 %v193_v26, %v193_v26  ;;  %v343_v28 = vpop.f32.mrb[2].mxu1 }
  0xdd   :  { %v196_v29 = vpop.f32.mrb[3].mxu1  ;;  %v278_v33 = vmul.f32 %v343_v28, %v343_v28 }
  0xde   :  { %v263_v31 = vadd.f32 %v196_v29, %v193_v26  ;;  %v276_v32 = vmul.f32 %v196_v29, %v196_v29 }
  0xe0   :  { %v264_v34 = vadd.f32 %v342_v25, %v263_v31  ;;  %v279_v35 = vadd.f32 %v276_v32, %v275_v27 }
  0xe2   :  { %v265_v36 = vadd.f32 %v343_v28, %v264_v34  ;;  %v280_v37 = vadd.f32 %v279_v35, %v277_v30 }
  0xe4   :  { %v266_v38 = vrot.slane %v265_v36, 4  ;;  %v281_v39 = vadd.f32 %v280_v37, %v278_v33 }
  0xe6   :  { %v267_v40 = vadd.f32 %v266_v38, %v265_v36  ;;  %v282_v41 = vrot.slane %v281_v39, 4 }
  0xe8   :  { %v268_v42 = vrot.slane %v267_v40, 2  ;;  %v283_v43 = vadd.f32 %v282_v41, %v281_v39 }
  0xea   :  { %v269_v44 = vadd.f32 %v268_v42, %v267_v40  ;;  %v284_v45 = vrot.slane %v283_v43, 2 }
  0xec   :  { %v270_v46 = vrot.slane %v269_v44, 1  ;;  %v285_v47 = vadd.f32 %v284_v45, %v283_v43 }
  0xee   :  { %v271_v49 = vadd.f32 %v270_v46, %v269_v44  ;;  %v286_v50 = vrot.slane %v285_v47, 1 }
  0xf0   :  { %v272_v52 = vadd.f32 %v271_v49, %v262_v48  ;;  %v287_v53 = vadd.f32 %v286_v50, %v285_v47 }
  0xf2   :  { %273 = vst [vmem:[%s452_s5] sm:$0x1] %v272_v52  ;;  %v288_v54 = vadd.f32 %v287_v53, %v274_v51 }
  0xf4   :  { %289 = vst [vmem:[%s452_s5 + $0x1] sm:$0x1] %v288_v54 }
 0x160   :  { %v336_v55 = vpop.f32.mrb[0].mxu0 }
 0x161   :  { %v131_v56 = vpop.f32.mrb[1].mxu0  ;;  %v249_v0 = vmul.f32 %v336_v55, %v336_v55 }
 0x162   :  { %v337_v57 = vpop.f32.mrb[2].mxu0  ;;  %v247_v60 = vmul.f32 %v131_v56, %v131_v56 }
 0x163   :  { %v323_v58 = vpack.c.bf16 %v337_v57, %v336_v55  ;;  %v134_v59 = vpop.f32.mrb[3].mxu0  ;;  %v250_v3 = vmul.f32 %v337_v57, %v337_v57 }
 0x164   :  { %v318_v61 = vpack.c.bf16 %v134_v59, %v131_v56  ;;  %v235_v62 = vadd.f32 %v134_v59, %v131_v56  ;;  %v248_v63 = vmul.f32 %v134_v59, %v134_v59 }
 0x165   :  { %325 = vst [vmem:[%s454_s3 + $0x8] sm:$0xff] %v323_v58  }
 0x166   :  { %319 = vst [vmem:[%s454_s3] sm:$0xff] %v318_v61   ;;  %v236_v1 = vadd.f32 %v336_v55, %v235_v62  ;;  %v251_v2 = vadd.f32 %v248_v63, %v247_v60 }
 0x168   :  { %v237_v4 = vadd.f32 %v337_v57, %v236_v1  ;;  %v252_v5 = vadd.f32 %v251_v2, %v249_v0 }
 0x16a   :  { %v238_v6 = vrot.slane %v237_v4, 4  ;;  %v253_v7 = vadd.f32 %v252_v5, %v250_v3 }
 0x16c   :  { %v239_v8 = vadd.f32 %v238_v6, %v237_v4  ;;  %v254_v9 = vrot.slane %v253_v7, 4 }
 0x16e   :  { %v240_v10 = vrot.slane %v239_v8, 2  ;;  %v255_v11 = vadd.f32 %v254_v9, %v253_v7 }
 0x170   :  { %v241_v12 = vadd.f32 %v240_v10, %v239_v8  ;;  %v256_v13 = vrot.slane %v255_v11, 2 }
 0x172   :  { %v242_v14 = vrot.slane %v241_v12, 1  ;;  %v257_v15 = vadd.f32 %v256_v13, %v255_v11 }
 0x174   :  { %v243_v17 = vadd.f32 %v242_v14, %v241_v12  ;;  %v258_v18 = vrot.slane %v257_v15, 1 }
 0x176   :  { %v244_v20 = vadd.f32 %v243_v17, %v234_v16  ;;  %v259_v21 = vadd.f32 %v258_v18, %v257_v15 }
 0x178   :  { %245 = vst [vmem:[%s453_s4] sm:$0x1] %v244_v20  ;;  %v260_v22 = vadd.f32 %v259_v21, %v246_v19 }
 0x17a   :  { %261 = vst [vmem:[%s453_s4 + $0x1] sm:$0x1] %v260_v22 }

// kernel: residual_cbam_forward.4
= control target key start
LH: loop header
LB: loop body
LE: loop exit
PB: predicated region body
PF: predicated region fallthrough
CT: control target
= control target key end

     0   :  { %v617_v1 = vmov 0.0   ;;  %v46_v33 = vlaneseq  ;;  %vm73_vm0 = vcmask 1040384   ;;  %vm92_vm1 = vcmask 1046528   ;;  %s771_s4 = inlined_call_operand.vmem [shape: bf16[384,128], index: 4, kind: input, shape index: {}]   ;;  %s772_s1 = inlined_call_operand.vmem [shape: f32[2,128], index: 1, kind: input, shape index: {}]   ;;  %s773_s0 = inlined_call_operand.vmem [shape: bf16[2,16,128], index: 0, kind: input, shape index: {}]   ;;  %s774_s2 = inlined_call_operand.vmem [shape: f32[1,128], index: 2, kind: input, shape index: {}]   ;;  %s775_s3 = inlined_call_operand.vmem [shape: f32[1,128], index: 3, kind: input, shape index: {}]   ;;  %s776_s6 = inlined_call_operand.vmem [shape: f32[2,128], index: 6, kind: output, shape index: {1}]   ;;  %s777_s5 = inlined_call_operand.vmem [shape: bf16[2,16,128], index: 5, kind: output, shape index: {0}]  }
   0x1   :  { %v591_v0 = vld [vmem:[%s771_s4 + $0x40] sm:$0xff]   ;;  %107 = vst [vmem:[#allocation2] sm:$0x1] %v617_v1  ;;  %108 = vst [vmem:[#allocation2 + $0x30] sm:$0x1] %v617_v1  ;;  %v594_v4 = vld [vmem:[%s771_s4 + $0x48] sm:$0xff]  }
   0x2   :  { %109 = vst [vmem:[#allocation2 + $0x2f] sm:$0x1] %v617_v1  ;;  %110 = vst [vmem:[#allocation2 + $0x5f] sm:$0x1] %v617_v1  ;;  %v592_v2 = vld [vmem:[%s771_s4] sm:$0xff]   ;;  %532 = vmatprep.subr.bf16.mxu0 %v591_v0  ;;  %v595_v5 = vld [vmem:[%s771_s4 + $0x8] sm:$0xff]  }
   0x3   :  { %v593_v3 = vld [vmem:[%s771_s4 + $0x80] sm:$0xff]   ;;  %533 = vmatpush3.bf16.msra.mxu0 %v592_v2  ;;  %v596_v6 = vld [vmem:[%s771_s4 + $0x88] sm:$0xff]   ;;  %v597_v7 = vld [vmem:[%s771_s4 + $0x50] sm:$0xff]   ;;  %v47_v34 = vshrl.u32 %v46_v33, 7  ;;  %443 = vst [vmem:[%s776_s6] sm:$0x3] %v617_v1 }
   0x4   :  { %570 = vmatprep.subr.bf16.mxu1 %v593_v3  ;;  %534 = vmatprep.subr.bf16.mxu0 %v594_v4  ;;  %v598_v8 = vld [vmem:[%s771_s4 + $0x10] sm:$0xff]   ;;  %v600_v10 = vld [vmem:[%s771_s4 + $0x58] sm:$0xff]   ;;  %v603_v13 = vld [vmem:[%s771_s4 + $0x60] sm:$0xff]  }
   0x5   :  { %571 = vmatpush3.bf16.msra.mxu1 %v593_v3  ;;  %v599_v9 = vld [vmem:[%s771_s4 + $0x90] sm:$0xff]   ;;  %v601_v11 = vld [vmem:[%s771_s4 + $0x18] sm:$0xff]   ;;  %v605_v14 = vld [vmem:[%s771_s4 + $0xa0] sm:$0xff]   ;;  %v48_v38 = vsub.s32 0, %v47_v34 }
   0x6   :  { %572 = vmatprep.subr.bf16.mxu1 %v596_v6  ;;  %v602_v12 = vld [vmem:[%s771_s4 + $0x98] sm:$0xff]   ;;  %v604_v15 = vld [vmem:[%s771_s4 + $0x20] sm:$0xff]   ;;  %v606_v16 = vld [vmem:[%s771_s4 + $0x68] sm:$0xff]  }
   0x7   :  { %535 = vmatpush3.bf16.msra.mxu0 %v595_v5  ;;  %v608_v17 = vld [vmem:[%s771_s4 + $0xa8] sm:$0xff]   ;;  %v609_v19 = vld [vmem:[%s771_s4 + $0x70] sm:$0xff]   ;;  %v612_v22 = vld [vmem:[%s771_s4 + $0x78] sm:$0xff]  }
   0x8   :  { %536 = vmatprep.subr.bf16.mxu0 %v597_v7  ;;  %v607_v18 = vld [vmem:[%s771_s4 + $0x28] sm:$0xff]   ;;  %v611_v20 = vld [vmem:[%s771_s4 + $0xb0] sm:$0xff]   ;;  %v23_v23 = vld [vmem:[%s772_s1] sm:$0x1] }
   0x9   :  { %573 = vmatpush3.bf16.msra.mxu1 %v596_v6  ;;  %v610_v21 = vld [vmem:[%s771_s4 + $0x30] sm:$0xff]   ;;  %v25_v24 = vld [vmem:[%s772_s1 + $0x1] sm:$0x1]  ;;  %v24_v25 = vmul.f32 0.03125, %v23_v23  ;;  %v614_v27 = vld [vmem:[%s771_s4 + $0xb8] sm:$0xff]  }
   0xa   :  { %574 = vmatprep.subr.bf16.mxu1 %v599_v9  ;;  %v26_v26 = vmul.f32 0.03125, %v25_v24  ;;  %v613_v28 = vld [vmem:[%s771_s4 + $0x38] sm:$0xff]   ;;  %v30_v35 = vld [vmem:[%s774_s2] sm:$0x1]  ;;  %v530_v37 = vld [vmem:[%s773_s0 + $0x8] sm:$0xff]  }
   0xb   :  { %537 = vmatpush3.bf16.msra.mxu0 %v598_v8  ;;  %v27_v29 = vmul.f32 %v24_v25, %v24_v25  ;;  %v513_v36 = vld [vmem:[%s773_s0] sm:$0xff]   ;;  %v518_v43 = vunpack.c.l.bf16 %v530_v37  ;;  %v519_v45 = vunpack.c.h.bf16 %v530_v37 }
   0xc   :  { %538 = vmatprep.subr.bf16.mxu0 %v600_v10  ;;  %v514_v41 = vunpack.c.l.bf16 %v513_v36  ;;  %v515_v42 = vunpack.c.h.bf16 %v513_v36  ;;  %v34_v44 = vld [vmem:[%s775_s3] sm:$0x1] }
   0xd   :  { %575 = vmatpush3.bf16.msra.mxu1 %v599_v9  ;;  %v28_v30 = vsub.f32 %v26_v26, %v27_v29 }
   0xe   :  { %576 = vmatprep.subr.bf16.mxu1 %v602_v12 }
   0xf   :  { %539 = vmatpush3.bf16.msra.mxu0 %v601_v11  ;;  %v29_v31 = vmax.f32 %v28_v30, 0.0 }
  0x10   :  { %540 = vmatprep.subr.bf16.mxu0 %v603_v13 }
  0x11   :  { %577 = vmatpush3.bf16.msra.mxu1 %v602_v12  ;;  %v31_v32 = vadd.f32 1e-05, %v29_v31 }
  0x12   :  { %578 = vmatprep.subr.bf16.mxu1 %v605_v14 }
  0x13   :  { %541 = vmatpush3.bf16.msra.mxu0 %v604_v15  ;;  %615 = vrsqrt.f32 %v31_v32 }
  0x14   :  { %542 = vmatprep.subr.bf16.mxu0 %v606_v16 }
  0x15   :  { %579 = vmatpush3.bf16.msra.mxu1 %v605_v14 }
  0x16   :  { %580 = vmatprep.subr.bf16.mxu1 %v608_v17 }
  0x17   :  { %543 = vmatpush3.bf16.msra.mxu0 %v607_v18 }
  0x18   :  { %544 = vmatprep.subr.bf16.mxu0 %v609_v19 }
  0x19   :  { %581 = vmatpush3.bf16.msra.mxu1 %v608_v17 }
  0x1a   :  { %582 = vmatprep.subr.bf16.mxu1 %v611_v20 }
  0x1b   :  { %545 = vmatpush3.bf16.msra.mxu0 %v610_v21 }
  0x1c   :  { %546 = vmatprep.subr.bf16.mxu0 %v612_v22 }
  0x1d   :  { %583 = vmatpush3.bf16.msra.mxu1 %v611_v20  ;;  %v616_v39 = vpop.eup %615 }
  0x1e   :  { %584 = vmatprep.subr.bf16.mxu1 %v614_v27  ;;  %v33_v40 = vmul.f32 %v616_v39, %v30_v35 }
  0x1f   :  { %547 = vmatpush3.bf16.msra.mxu0 %v613_v28 }
  0x20   :  { %v35_v46 = vmul.f32 %v33_v40, %v24_v25  ;;  %v49_v47 = vrot.slane %v33_v40, %v48_v38 }
  0x21   :  { %585 = vmatpush3.bf16.msra.mxu1 %v614_v27 }
  0x22   :  { %v36_v48 = vsub.f32 %v34_v44, %v35_v46  ;;  %v51_v49 = vmul.f32 %v514_v41, %v49_v47  ;;  %v52_v50 = vmul.f32 %v515_v42, %v49_v47  ;;  %v53_v51 = vmul.f32 %v518_v43, %v49_v47 }
  0x23   :  { %v54_v52 = vmul.f32 %v519_v45, %v49_v47 }
  0x24   :  { %v59_v53 = vrot.slane %v36_v48, %v48_v38 }
  0x26   :  { %v61_v54 = vadd.f32 %v59_v53, %v51_v49  ;;  %v62_v55 = vadd.f32 %v59_v53, %v52_v50  ;;  %v63_v56 = vadd.f32 %v59_v53, %v53_v51  ;;  %v64_v57 = vadd.f32 %v59_v53, %v54_v52 }
  0x28   :  { %v65_v58 = vmax.f32 %v61_v54, 0.0  ;;  %v66_v59 = vmax.f32 %v62_v55, 0.0  ;;  %v67_v60 = vmax.f32 %v63_v56, 0.0  ;;  %v68_v61 = vmax.f32 %v64_v57, 0.0 }
  0x2a   :  { %v124_v62 = vpack.c.bf16 %v66_v59, %v65_v58  ;;  %v74_v63 = vrot.slane %v65_v58, 7  ;;  %v75_v0 = vrot.slane %v66_v59, 7  ;;  %v93_v2 = vrot.slane %v65_v58, 1 }
  0x2b   :  { %v94_v3 = vrot.slane %v66_v59, 1  ;;  %v96_v4 = vrot.slane %v67_v60, 1  ;;  %v97_v5 = vrot.slane %v68_v61, 1  ;;  %v77_v7 = vrot.slane %v67_v60, 7 }
  0x2c   :  { %353 = vmatprep.mubr.bf16.mxu0 %v124_v62  ;;  %v76_v6 = vsel %vm73_vm0, %v74_v63, %v75_v0  ;;  %84 = vst [vmem:[#allocation2] sm:$0xfe] %v74_v63  ;;  %v78_v8 = vrot.slane %v68_v61, 7  ;;  %v127_v13 = vpack.c.bf16 %v68_v61, %v67_v60  ;;  %v444_v61 = vld [vmem:[%s776_s6] sm:$0x1] }
  0x2d   :  { %v95_v9 = vsel %vm92_vm1, %v93_v2, %v94_v3  ;;  %104 = vst [vmem:[#allocation2 + $0x28] sm:$0x7f] %v94_v3  ;;  %v98_v10 = vsel %vm92_vm1, %v96_v4, %v97_v5  ;;  %106 = vst [vmem:[#allocation2 + $0x58] sm:$0x7f] %v97_v5  ;;  %v456_v0 = vld [vmem:[%s776_s6 + $0x1] sm:$0x1] }
  0x2e   :  { %v79_v11 = vsel %vm73_vm0, %v77_v7, %v78_v8  ;;  %86 = vst [vmem:[#allocation2 + $0x30] sm:$0xfe] %v77_v7 }
  0x33   :  { %v111_v12 = vld [vmem:[#allocation2] sm:$0xff] }
  0x34   :  { %v123_v14 = vpack.c.bf16 %v76_v6, %v111_v12  ;;  %v116_v15 = vld [vmem:[#allocation2 + $0x28] sm:$0xff]  ;;  %v122_v16 = vld [vmem:[#allocation2 + $0x58] sm:$0xff] }
  0x35   :  { %v125_v17 = vpack.c.bf16 %v116_v15, %v95_v9  ;;  %v128_v18 = vpack.c.bf16 %v122_v16, %v98_v10  ;;  %v117_v19 = vld [vmem:[#allocation2 + $0x30] sm:$0xff] }
  0x36   :  { %354 = vmatmul.mubr.bf16.vlgmr.msra.gmra.mrb[0].mxu0 %v123_v14  ;;  %v126_v20 = vpack.c.bf16 %v79_v11, %v117_v19 }
  0x37   :  { %586 = vmatprep.mubr.bf16.mxu1 %v125_v17  ;;  %361 = vmatprep.mubr.bf16.mxu0 %v127_v13 }
  0x38   :  { %587 = vmatmul.mubr.bf16.vlgmr.msra.gmra.mrb[0].mxu1 %v128_v18 }
  0x3e   :  { %362 = vmatmul.mubr.bf16.gmra.mrb[4].mxu0 %v126_v20 }
 0x109   :  { %v548_v21 = vpop.f32.mrb[0].mxu0 }
 0x10a   :  { %v549_v22 = vpop.f32.mrb[1].mxu0 }
 0x10b   :  { %v550_v23 = vadd.f32 %v549_v22, %v548_v21  ;;  %v551_v24 = vpop.f32.mrb[2].mxu0  ;;  %v588_v25 = vpop.f32.mrb[0].mxu1 }
 0x10c   :  { %v552_v26 = vpop.f32.mrb[3].mxu0  ;;  %v404_v27 = vpop.f32.mrb[1].mxu1 }
 0x10d   :  { %v553_v28 = vadd.f32 %v552_v26, %v551_v24  ;;  %v405_v29 = vadd.f32 %v550_v23, %v404_v27  ;;  %v589_v30 = vpop.f32.mrb[2].mxu1 }
 0x10e   :  { %v407_v31 = vpop.f32.mrb[3].mxu1 }
 0x10f   :  { %v408_v32 = vadd.f32 %v553_v28, %v407_v31  ;;  %v457_v33 = vmul.f32 %v405_v29, %v405_v29 }
 0x111   :  { %v523_v34 = vpack.c.bf16 %v408_v32, %v405_v29  ;;  %v445_v35 = vadd.f32 %v408_v32, %v405_v29  ;;  %v458_v36 = vmul.f32 %v408_v32, %v408_v32  ;;  %v554_v37 = vpop.f32.mrb[4].mxu0 }
 0x112   :  { %v555_v38 = vpop.f32.mrb[5].mxu0 }
 0x113   :  { %524 = vst [vmem:[%s777_s5] sm:$0xff] %v523_v34   ;;  %v461_v1 = vadd.f32 %v458_v36, %v457_v33  ;;  %v556_v39 = vadd.f32 %v555_v38, %v554_v37  ;;  %v557_v40 = vpop.f32.mrb[6].mxu0 }
 0x114   :  { %v558_v41 = vpop.f32.mrb[7].mxu0 }
 0x115   :  { %v413_v42 = vadd.f32 %v588_v25, %v556_v39  ;;  %v559_v43 = vadd.f32 %v558_v41, %v557_v40 }
 0x117   :  { %v446_v44 = vadd.f32 %v445_v35, %v413_v42  ;;  %v459_v45 = vmul.f32 %v413_v42, %v413_v42  ;;  %v416_v46 = vadd.f32 %v589_v30, %v559_v43 }
 0x119   :  { %v462_v47 = vadd.f32 %v461_v1, %v459_v45  ;;  %v528_v48 = vpack.c.bf16 %v416_v46, %v413_v42  ;;  %v447_v49 = vadd.f32 %v446_v44, %v416_v46  ;;  %v460_v50 = vmul.f32 %v416_v46, %v416_v46 }
 0x11b   :  { %531 = vst [vmem:[%s777_s5 + $0x8] sm:$0xff] %v528_v48   ;;  %v448_v51 = vrot.slane %v447_v49, 4  ;;  %v463_v52 = vadd.f32 %v462_v47, %v460_v50 }
 0x11d   :  { %v449_v53 = vadd.f32 %v448_v51, %v447_v49  ;;  %v464_v54 = vrot.slane %v463_v52, 4 }
 0x11f   :  { %v450_v55 = vrot.slane %v449_v53, 2  ;;  %v465_v56 = vadd.f32 %v464_v54, %v463_v52 }
 0x121   :  { %v451_v57 = vadd.f32 %v450_v55, %v449_v53  ;;  %v466_v58 = vrot.slane %v465_v56, 2 }
 0x123   :  { %v452_v59 = vrot.slane %v451_v57, 1  ;;  %v467_v60 = vadd.f32 %v466_v58, %v465_v56 }
 0x125   :  { %v453_v62 = vadd.f32 %v452_v59, %v451_v57  ;;  %v468_v63 = vrot.slane %v467_v60, 1 }
 0x127   :  { %v454_v2 = vadd.f32 %v453_v62, %v444_v61  ;;  %v469_v3 = vadd.f32 %v468_v63, %v467_v60 }
 0x129   :  { %455 = vst [vmem:[%s776_s6] sm:$0x1] %v454_v2  ;;  %v470_v4 = vadd.f32 %v469_v3, %v456_v0 }
 0x12b   :  { %471 = vst [vmem:[%s776_s6 + $0x1] sm:$0x1] %v470_v4 }

// kernel: residual_cbam_forward.5
= control target key start
LH: loop header
LB: loop body
LE: loop exit
PB: predicated region body
PF: predicated region fallthrough
CT: control target
= control target key end

     0   :  { %17 = vsyncpa [#allocation4], 0  ;;  %s1057_s0 = inlined_call_operand.vmem [shape: f32[2,16,4], index: 0, kind: input, shape index: {}]   ;;  %s1058_s1 = inlined_call_operand.vmem [shape: bf16[2,16,128], index: 1, kind: input, shape index: {}]   ;;  %s1059_s2 = inlined_call_operand.vmem [shape: f32[2,128], index: 2, kind: input, shape index: {}]   ;;  %s1060_s3 = inlined_call_operand.vmem [shape: f32[1,128], index: 3, kind: input, shape index: {}]   ;;  %s1061_s4 = inlined_call_operand.vmem [shape: f32[1,128], index: 4, kind: input, shape index: {}]   ;;  %s1062_s5 = inlined_call_operand.vmem [shape: f32[2,128], index: 5, kind: input, shape index: {}]   ;;  %s1063_s6 = inlined_call_operand.vmem [shape: f32[1,128], index: 6, kind: input, shape index: {}]   ;;  %s1064_s7 = inlined_call_operand.vmem [shape: f32[1,128], index: 7, kind: input, shape index: {}]   ;;  %s1065_s8 = inlined_call_operand.vmem [shape: bf16[4,128], index: 8, kind: input, shape index: {}]   ;;  %s1066_s9 = inlined_call_operand.vmem [shape: bf16[128,2], index: 9, kind: input, shape index: {}]   ;;  %s1067_s10 = inlined_call_operand.vmem [shape: bf16[2,128], index: 10, kind: input, shape index: {}]   ;;  %s1068_s11 = inlined_call_operand.vmem [shape: f32[2,7], index: 11, kind: input, shape index: {}]   ;;  %s1069_s12 = inlined_call_operand.vmem [shape: f32[2,16,16], index: 12, kind: output, shape index: {}]  }
   0x1   :  { %s46_s23 = sshll.u32 %s1068_s11, 4  ;;  %s47_s23 = int_to_ptr.vmem [resolvable:$true] %s46_s23 }
   0x2   :  { %s788_s24 = scalar_lea.vmem %s47_s23, 32  ;;  %p793_p1 = scmp.lt.s32.totalorder %s47_s23, %s47_s23 }
   0x3   :  { %p789_p0 = scmp.ne.s32.totalorder %s47_s23, %s788_s24  ;;  %p794_p2 = scmp.lt.s32.totalorder %s788_s24, %s788_s24 }
   0x5   :  { %p795_p3 = por %p794_p2, %p793_p1 }
   0x7   :  { %p796_p4 = pnand %p795_p3, %p789_p0 }
   0x9   :  { %799 = shalt.err (!%p796_p4)
}
   0xa   :  { %s802_s25 = smov [#allocation3]  }
   0xb   :  { %49 = dma.vmem_to_smem %s47_s23, 32, %s802_s25, [#allocation4]  }
   0xc   :  { %800 = dma.done.wait [#allocation4], 32  }
   0xd   :  { %801 = vsyncadd [#allocation4], 4294967264 }
   0xe   :  { %53 = sfence }
   0xf   :  { %v772_v0 = vld [vmem:[%s1066_s9] sm:$0xff]   ;;  %v803_v1 = vmov 0.0   ;;  %v773_v2 = vld [vmem:[%s1066_s9 + $0x8] sm:$0xff]   ;;  %vm804_vm0 = vmmov 0   ;;  %v774_v3 = vld [vmem:[%s1066_s9 + $0x10] sm:$0xff]   ;;  %v78_v15 = vlaneseq  ;;  %vm135_vm1 = vcmask 1043459  }
  0x10   :  { %729 = vmatprep.subr.bf16.mxu0 %v803_v1  ;;  %749 = vmatprep.subr.bf16.mxu1 %v803_v1  ;;  %v55_v4 = vld [vmem:[%s1059_s2] sm:$0x1]  ;;  %v57_v5 = vld [vmem:[%s1059_s2 + $0x1] sm:$0x1]  ;;  %v775_v8 = vld [vmem:[%s1066_s9 + $0x18] sm:$0xff]   ;;  %vm130_vm2 = vcmask 1041409  }
  0x11   :  { %730 = vmatpush3.bf16.msra.mxu0 %v772_v0  ;;  %745 = vmatprep.mubr.msk.bf16.mxu0 %vm804_vm0, %v803_v1  ;;  %v56_v6 = vmul.f32 0.03125, %v55_v4  ;;  %v58_v7 = vmul.f32 0.03125, %v57_v5  ;;  %v776_v11 = vld [vmem:[%s1066_s9 + $0x20] sm:$0xff]   ;;  %v777_v14 = vld [vmem:[%s1066_s9 + $0x28] sm:$0xff]   ;;  %v778_v16 = vld [vmem:[%s1066_s9 + $0x30] sm:$0xff]   ;;  %v918_v17 = vshrl.u32 %v78_v15, 7 }
  0x12   :  { %731 = vmatprep.subr.bf16.mxu0 %v803_v1  ;;  %751 = vmatprep.mubr.msk.bf16.mxu1 %vm804_vm0, %v803_v1  ;;  %v779_v18 = vld [vmem:[%s1066_s9 + $0x38] sm:$0xff]   ;;  %v62_v19 = vld [vmem:[%s1060_s3] sm:$0x1]  ;;  %v714_v21 = vld [vmem:[%s1058_s1 + $0x8] sm:$0xff]   ;;  %vm138_vm3 = vcmask 1041408   ;;  %vm252_vm4 = vcmask 1040384  }
  0x13   :  { %v59_v9 = vmul.f32 %v56_v6, %v56_v6  ;;  %v707_v20 = vld [vmem:[%s1058_s1] sm:$0xff]   ;;  %v934_v22 = vsub.s32 0, %v918_v17  ;;  %v712_v27 = vunpack.c.l.bf16 %v714_v21  ;;  %v713_v29 = vunpack.c.h.bf16 %v714_v21  ;;  %s693_s2 = sld [smem:[#allocation3 + $0x81]]  ;;  %s428_s21 = sld [smem:[#allocation3]] }
  0x14   :  { %v708_v25 = vunpack.c.l.bf16 %v707_v20  ;;  %v709_v26 = vunpack.c.h.bf16 %v707_v20  ;;  %v66_v28 = vld [vmem:[%s1061_s4] sm:$0x1]  ;;  %vm248_vm5 = vcmask 15360   ;;  %vm344_vm7 = vcmask 19456   ;;  %s691_s22 = sld [smem:[#allocation3 + $0x80]]  ;;  %s696_s23 = sld [smem:[#allocation3 + $0x3]] }
  0x15   :  { %732 = vmatpush3.bf16.msra.mxu0 %v773_v2  ;;  %v60_v10 = vsub.f32 %v58_v7, %v59_v9  ;;  %vm346_vm8 = vcmask 175256   ;;  %345 = vst.msk [vmem:[#allocation2] sm:$0xf] %vm344_vm7, %v803_v1  ;;  %vm571_vm9 = vcmask 31744   ;;  %vm374_vm10 = vcmask 154712   ;;  %s694_s24 = sld [smem:[#allocation3 + $0x2]] }
  0x16   :  { %733 = vmatprep.subr.bf16.mxu0 %v803_v1  ;;  %347 = vst.msk [vmem:[#allocation2] sm:$0xf] %vm346_vm8, %v803_v1  ;;  %vm387_vm11 = vcmask 148504   ;;  %s698_s25 = sld [smem:[#allocation3 + $0x4]]  ;;  %s1019_s26 = sld [smem:[#allocation3 + $0x82]]  ;;  %vm672_vm12 = vcmask 130048  }
  0x17   :  { %v61_v12 = vmax.f32 %v60_v10, 0.0  ;;  %s700_s27 = sld [smem:[#allocation3 + $0x5]]  ;;  %s806_s11 = smov 127  }
  0x18   :  { %s697_s28 = sld [smem:[#allocation3 + $0x83]]  ;;  %s702_s29 = sld [smem:[#allocation3 + $0x6]] }
  0x19   :  { %734 = vmatpush3.bf16.msra.mxu0 %v774_v3  ;;  %v63_v13 = vadd.f32 1e-05, %v61_v12  ;;  %s807_s30 = smov 125   ;;  %s699_s9 = sld [smem:[#allocation3 + $0x84]] }
  0x1a   :  { %735 = vmatprep.subr.bf16.mxu0 %v803_v1  ;;  %s808_s13 = smov 126   ;;  %s809_s1 = smov 124  }
  0x1b   :  { %780 = vrsqrt.f32 %v63_v13  ;;  %v247_v13 = vld [vmem:[%s1067_s10] sm:$0x1]  ;;  %s701_s3 = sld [smem:[#allocation3 + $0x85]]  ;;  %s810_s4 = smov 123  }
  0x1c   :  { %s703_s10 = sld [smem:[#allocation3 + $0x86]]  ;;  %s811_s14 = smov 122  }
  0x1d   :  { %736 = vmatpush3.bf16.msra.mxu0 %v775_v8 }
  0x1e   :  { %737 = vmatprep.subr.bf16.mxu0 %v803_v1 }
  0x21   :  { %738 = vmatpush3.bf16.msra.mxu0 %v776_v11 }
  0x22   :  { %739 = vmatprep.subr.bf16.mxu0 %v803_v1 }
  0x25   :  { %740 = vmatpush3.bf16.msra.mxu0 %v777_v14  ;;  %v781_v23 = vpop.eup %780  ;;  %v254_v14 = vsel %vm252_vm4, %v247_v13, 0 }
  0x26   :  { %741 = vmatprep.subr.bf16.mxu0 %v803_v1  ;;  %v65_v24 = vmul.f32 %v781_v23, %v62_v19  ;;  %750 = vmatpush3.bf16.msra.mxu1 %v254_v14 }
  0x28   :  { %v67_v30 = vmul.f32 %v65_v24, %v56_v6  ;;  %v81_v31 = vrot.slane %v65_v24, %v934_v22 }
  0x29   :  { %742 = vmatpush3.bf16.msra.mxu0 %v778_v16 }
  0x2a   :  { %743 = vmatprep.subr.bf16.mxu0 %v803_v1  ;;  %v68_v32 = vsub.f32 %v66_v28, %v67_v30  ;;  %v83_v33 = vmul.f32 %v708_v25, %v81_v31  ;;  %v84_v34 = vmul.f32 %v709_v26, %v81_v31  ;;  %v85_v35 = vmul.f32 %v712_v27, %v81_v31  ;;  %v566_v1 = vld [vmem:[%s1057_s0 + $0x10] sm:$0xff] }
  0x2b   :  { %v86_v36 = vmul.f32 %v713_v29, %v81_v31  ;;  %v805_v31 = vmov 1966171168  }
  0x2c   :  { %v91_v37 = vrot.slane %v68_v32, %v934_v22  ;;  %v306_v32 = vunpack.c.l.s4 %v805_v31  ;;  %v447_v31 = vstv %s693_s2 }
  0x2d   :  { %744 = vmatpush3.bf16.msra.mxu0 %v779_v18 }
  0x2e   :  { %v941_v38 = vadd.f32 %v91_v37, %v83_v33  ;;  %v943_v39 = vadd.f32 %v91_v37, %v84_v34  ;;  %v945_v40 = vadd.f32 %v91_v37, %v85_v35  ;;  %v947_v41 = vadd.f32 %v91_v37, %v86_v36 }
  0x2f   :  { %v307_v33 = vunpack.c.0.s8 %v306_v32 }
  0x30   :  { %v97_v42 = vadd.f32 %v943_v39, %v941_v38  ;;  %v104_v43 = vadd.f32 %v947_v41, %v945_v40  ;;  %v114_v44 = vmax.f32 %v941_v38, %v943_v39  ;;  %v121_v45 = vmax.f32 %v945_v40, %v947_v41 }
  0x31   :  { %v310_v36 = vsub.s32 %v307_v33, %v918_v17  ;;  %v430_v33 = vstv %s428_s21 }
  0x32   :  { %v98_v46 = vrot.slane %v97_v42, 4  ;;  %v105_v47 = vrot.slane %v104_v43, 4  ;;  %v115_v48 = vrot.slane %v114_v44, 4  ;;  %v122_v49 = vrot.slane %v121_v45, 4 }
  0x34   :  { %v99_v50 = vadd.f32 %v98_v46, %v97_v42  ;;  %v106_v51 = vadd.f32 %v105_v47, %v104_v43  ;;  %v116_v52 = vmax.f32 %v114_v44, %v115_v48  ;;  %v123_v53 = vmax.f32 %v121_v45, %v122_v49 }
  0x35   :  { %v342_v43 = vand.u32 127, %v78_v15 }
  0x36   :  { %v100_v54 = vrot.slane %v99_v50, 2  ;;  %v107_v55 = vrot.slane %v106_v51, 2  ;;  %v117_v56 = vrot.slane %v116_v52, 2  ;;  %v124_v57 = vrot.slane %v123_v53, 2 }
  0x37   :  { %vm343_vm6 = vcmp.lt.s32.totalorder %v342_v43, 16 }
  0x38   :  { %v101_v58 = vadd.f32 %v100_v54, %v99_v50  ;;  %v108_v59 = vadd.f32 %v107_v55, %v106_v51  ;;  %v118_v60 = vmax.f32 %v116_v52, %v117_v56  ;;  %v125_v61 = vmax.f32 %v123_v53, %v124_v57  ;;  %v564_v53 = vld [vmem:[%s1057_s0] sm:$0xff]  ;;  %v565_v54 = vld [vmem:[%s1057_s0 + $0x8] sm:$0xff]  ;;  %v567_v57 = vld [vmem:[%s1057_s0 + $0x18] sm:$0xff]  ;;  %s692_s0 = sld [smem:[#allocation3 + $0x1]] }
  0x39   :  { %v568_v56 = vpack.c.bf16 %v565_v54, %v564_v53  ;;  %v519_v54 = vstv %s702_s29 }
  0x3a   :  { %v102_v62 = vrot.slane %v101_v58, 1  ;;  %v109_v63 = vrot.slane %v108_v59, 1  ;;  %v119_v0 = vrot.slane %v118_v60, 1  ;;  %v126_v2 = vrot.slane %v125_v61, 1 }
  0x3c   :  { %v103_v3 = vadd.f32 %v102_v62, %v101_v58  ;;  %v110_v4 = vadd.f32 %v109_v63, %v108_v59  ;;  %v120_v5 = vmax.f32 %v118_v60, %v119_v0  ;;  %v127_v6 = vmax.f32 %v125_v61, %v126_v2 }
  0x3d   :  { %v569_v58 = vpack.c.bf16 %v567_v57, %v566_v1  ;;  %v364_v61 = vadd.s32 4294967293, %v342_v43  ;;  %v369_v62 = vadd.s32 4294967285, %v342_v43 }
  0x3e   :  { %v112_v7 = vmul.f32 0.0625, %v103_v3  ;;  %v113_v8 = vmul.f32 0.0625, %v110_v4  ;;  %v136_v9 = vsel %vm135_vm1, %v127_v6, %v120_v5 }
  0x3f   :  { %v367_v3 = vsub.s32 %v364_v61, %v918_v17  ;;  %v372_v5 = vsub.s32 %v369_v62, %v918_v17 }
  0x40   :  { %v131_v10 = vsel %vm130_vm2, %v113_v8, %v112_v7 }
  0x41   :  { %v139_v11 = vsel %vm138_vm3, %v131_v10, %v136_v9 }
  0x42   :  { %v140_v12 = vpack.c.bf16 %v139_v11, %v139_v11 }
  0x44   :  { %746 = vmatmul.mubr.bf16.vlgmr.msra.gmra.mrb[0].mxu0 %v140_v12 }
 0x117   :  { %v239_v16 = vpop.f32.mrb[0].mxu0 }
 0x118   :  { %v245_v18 = vmax.f32 %v239_v16, 0.0  ;;  %v747_v19 = vpop.f32.mrb[1].mxu0 }
 0x119   :  { %v242_v20 = vpop.f32.mrb[2].mxu0 }
 0x11a   :  { %v246_v21 = vpack.c.bf16 %v245_v18, %v245_v18  ;;  %v748_v23 = vpop.f32.mrb[3].mxu0 }
 0x11c   :  { %752 = vmatmul.mubr.msk.bf16.vlgmr.msra.gmra.mrb[0].mxu1 %vm248_vm5, %v246_v21 }
 0x11d   :  { %757 = vmatprep.mubr.msk.bf16.mxu1 %vm571_vm9, %v568_v56  ;;  %v495_v56 = vstv %s699_s9 }
 0x1ef   :  { %v290_v24 = vpop.f32.mrb[0].mxu1 }
 0x1f0   :  { %v297_v25 = vrot.slane %v290_v24, 2  ;;  %v753_v26 = vpop.f32.mrb[1].mxu1 }
 0x1f1   :  { %v293_v27 = vpop.f32.mrb[2].mxu1 }
 0x1f2   :  { %v299_v28 = vadd.f32 %v297_v25, %v290_v24  ;;  %v754_v29 = vpop.f32.mrb[3].mxu1 }
 0x1f3   :  { %v439_v29 = vstv %s692_s0 }
 0x1f4   :  { %v300_v30 = vmul.f32 0.5, %v299_v28 }
 0x1f6   :  { %782 = vtanh.f32 %v300_v30 }
 0x200   :  { %v783_v34 = vpop.eup %782 }
 0x201   :  { %v302_v35 = vadd.f32 1.0, %v783_v34  ;;  %v435_v34 = vstv %s691_s22 }
 0x203   :  { %v303_v37 = vmul.f32 0.5, %v302_v35 }
 0x205   :  { %v311_v42 = vrot.slane %v303_v37, %v310_v36 }
 0x207   :  { %v319_v44 = vrot.slane %v311_v42, %v310_v36  ;;  %v312_v45 = vcombine.high %v311_v42, %v311_v42  ;;  %v455_v42 = vstv %s694_s24 }
 0x209   :  { %v330_v46 = vrot.slane %v319_v44, %v934_v22  ;;  %v326_v47 = vrot.slane %v312_v45, %v310_v36  ;;  %v471_v36 = vstv %s696_s23 }
 0x20b   :  { %v966_v48 = vmul.f32 %v330_v46, %v941_v38  ;;  %v969_v49 = vmul.f32 %v330_v46, %v943_v39  ;;  %v334_v50 = vrot.slane %v326_v47, %v934_v22  ;;  %v487_v46 = vstv %s698_s25 }
 0x20d   :  { %348 = vadd.xlane.f32.xlu0 %v966_v48  ;;  %v392_v51 = vsel %vm343_vm6, %v969_v49, -1e+30  ;;  %v976_v15 = vmul.f32 %v334_v50, %v945_v40  ;;  %v391_v38 = vsel %vm343_vm6, %v966_v48, -1e+30  ;;  %v983_v39 = vmul.f32 %v334_v50, %v947_v41  ;;  %v570_v41 = vld [vmem:[%s1065_s8] sm:$0x3] }
 0x20e   :  { %397 = vmax.xlane.f32.xlu1 %v392_v51  ;;  %761 = vmatprep.subr.msk.bf16.mxu1 %vm138_vm3, %v570_v41  ;;  %v579_v55 = vsel %vm138_vm3, %v570_v41, 0  ;;  %v463_v51 = vstv %s1019_s26  ;;  %v479_v41 = vstv %s697_s28 }
 0x20f   :  { %v393_v52 = vsel %vm343_vm6, %v976_v15, -1e+30  ;;  %v394_v40 = vsel %vm343_vm6, %v983_v39, -1e+30  ;;  %756 = vmatpush3.bf16.msra.mxu1 %v579_v55 }
 0x211   :  { %350 = vadd.xlane.f32.xlu0 %v969_v49 }
 0x212   :  { %352 = vadd.xlane.f32.xlu1 %v976_v15  ;;  %758 = vmatmul.mubr.msk.bf16.vlgmr.msra.gmra.mrb[4].mxu1 %vm571_vm9, %v569_v58  ;;  %v511_v58 = vstv %s701_s3 }
 0x215   :  { %395 = vmax.xlane.f32.xlu0 %v391_v38 }
 0x216   :  { %354 = vadd.xlane.f32.xlu1 %v983_v39 }
 0x219   :  { %399 = vmax.xlane.f32.xlu0 %v393_v52  ;;  %v503_v52 = vstv %s700_s27 }
 0x21a   :  { %401 = vmax.xlane.f32.xlu1 %v394_v40 }
 0x29a   :  { %v349_v59 = vpop.xlane.xlu0 %348 }
 0x29b   :  { %v398_v60 = vpop.xlane.xlu1 %397  ;;  %v356_v4 = vmul.f32 0.0625, %v349_v59 }
 0x29c   :  { %v414_v20 = vrot.slane %v398_v60, %v372_v5  ;;  %v527_v60 = vstv %s703_s10 }
 0x29d   :  { %v368_v11 = vrot.slane %v356_v4, %v367_v3 }
 0x29e   :  { %v351_v63 = vpop.xlane.xlu0 %350 }
 0x29f   :  { %v353_v0 = vpop.xlane.xlu1 %352  ;;  %v357_v2 = vmul.f32 0.0625, %v351_v63 }
 0x2a0   :  { %v358_v6 = vmul.f32 0.0625, %v353_v0 }
 0x2a1   :  { %v373_v9 = vrot.slane %v357_v2, %v372_v5 }
 0x2a2   :  { %v396_v7 = vpop.xlane.xlu0 %395  ;;  %v379_v12 = vrot.slane %v358_v6, %v367_v3 }
 0x2a3   :  { %v355_v8 = vpop.xlane.xlu1 %354  ;;  %v410_v13 = vrot.slane %v396_v7, %v367_v3  ;;  %v375_v21 = vsel %vm374_vm10, %v373_v9, %v368_v11 }
 0x2a4   :  { %v359_v10 = vmul.f32 0.0625, %v355_v8 }
 0x2a5   :  { %v415_v26 = vsel %vm374_vm10, %v414_v20, %v410_v13 }
 0x2a6   :  { %v383_v14 = vrot.slane %v359_v10, %v372_v5  ;;  %v400_v16 = vpop.xlane.xlu0 %399 }
 0x2a7   :  { %v419_v18 = vrot.slane %v400_v16, %v367_v3  ;;  %v402_v19 = vpop.xlane.xlu1 %401 }
 0x2a8   :  { %v384_v23 = vsel %vm374_vm10, %v383_v14, %v379_v12  ;;  %v423_v24 = vrot.slane %v402_v19, %v372_v5 }
 0x2a9   :  { %v385_v25 = vsel %vm130_vm2, %v384_v23, %v375_v21 }
 0x2aa   :  { %388 = vst.msk [vmem:[#allocation2] sm:$0x3] %vm387_vm11, %v385_v25  ;;  %v424_v27 = vsel %vm374_vm10, %v423_v24, %v419_v18 }
 0x2ab   :  { %v425_v28 = vsel %vm130_vm2, %v424_v27, %v415_v26 }
 0x2ac   :  { %427 = vst.msk [vmem:[#allocation2 + $0x2] sm:$0x3] %vm387_vm11, %v425_v28 }
 0x2b1   :  { %v429_v30 = vld [vmem:[#allocation2] sm:$0x3] }
 0x2b2   :  { %v440_v32 = vmul.f32 %v439_v29, %v429_v30  ;;  %v431_v43 = vmul.f32 %v430_v33, %v429_v30  ;;  %v472_v45 = vmul.f32 %v471_v36, %v429_v30  ;;  %v456_v50 = vmul.f32 %v455_v42, %v429_v30 }
 0x2b3   :  { %v434_v35 = vld [vmem:[#allocation2 + $0x2] sm:$0x3]  ;;  %v488_v38 = vmul.f32 %v487_v46, %v429_v30  ;;  %v504_v53 = vmul.f32 %v503_v52, %v429_v30  ;;  %v520_v1 = vmul.f32 %v519_v54, %v429_v30 }
 0x2b4   :  { %442 = vrot.lane.b32.xlu0 %v440_v32, %s806_s11  ;;  %v448_v37 = vmul.f32 %v447_v31, %v434_v35  ;;  %v436_v44 = vmul.f32 %v435_v34, %v434_v35  ;;  %v464_v40 = vmul.f32 %v463_v51, %v434_v35  ;;  %v480_v55 = vmul.f32 %v479_v41, %v434_v35  ;;  %v637_v51 = vld [vmem:[%s1063_s6] sm:$0x1] }
 0x2b5   :  { %v496_v57 = vmul.f32 %v495_v56, %v434_v35  ;;  %v512_v59 = vmul.f32 %v511_v58, %v434_v35  ;;  %v528_v61 = vmul.f32 %v527_v60, %v434_v35  ;;  %v551_v35 = vsub.s32 1, %v918_v17 }
 0x2b6   :  { %450 = vrot.lane.b32.xlu1 %v448_v37, %s806_s11  ;;  %v437_v47 = vadd.f32 %v436_v44, %v431_v43  ;;  %v630_v37 = vld [vmem:[%s1062_s5] sm:$0x1]  ;;  %v632_v43 = vld [vmem:[%s1062_s5 + $0x1] sm:$0x1] }
 0x2b7   :  { %v631_v42 = vmul.f32 0.03125, %v630_v37  ;;  %v633_v44 = vmul.f32 0.03125, %v632_v43 }
 0x2b8   :  { %474 = vrot.lane.b32.xlu0 %v472_v45, %s807_s30 }
 0x2b9   :  { %v634_v45 = vmul.f32 %v631_v42, %v631_v42 }
 0x2ba   :  { %458 = vrot.lane.b32.xlu1 %v456_v50, %s808_s13 }
 0x2bb   :  { %v635_v46 = vsub.f32 %v633_v44, %v634_v45 }
 0x2bc   :  { %490 = vrot.lane.b32.xlu0 %v488_v38, %s809_s1 }
 0x2be   :  { %466 = vrot.lane.b32.xlu1 %v464_v40, %s808_s13  ;;  %v641_v40 = vld [vmem:[%s1064_s7] sm:$0x1] }
 0x2c0   :  { %506 = vrot.lane.b32.xlu0 %v504_v53, %s810_s4 }
 0x2c2   :  { %482 = vrot.lane.b32.xlu1 %v480_v55, %s807_s30 }
 0x2c4   :  { %522 = vrot.lane.b32.xlu0 %v520_v1, %s811_s14 }
 0x2c6   :  { %498 = vrot.lane.b32.xlu1 %v496_v57, %s809_s1 }
 0x2ca   :  { %514 = vrot.lane.b32.xlu1 %v512_v59, %s810_s4 }
 0x2ce   :  { %530 = vrot.lane.b32.xlu1 %v528_v61, %s811_s14 }
 0x2e5   :  { %v1022_v63 = vpop.f32.mrb[4].mxu1 }
 0x2e6   :  { %v615_v0 = vpop.f32.mrb[5].mxu1 }
 0x2e7   :  { %v760_v3 = vpop.f32.mrb[6].mxu1 }
 0x2e8   :  { %v618_v30 = vpop.f32.mrb[7].mxu1 }
 0x326   :  { %v443_v62 = vpop.permute.xlu0 %442 }
 0x327   :  { %v445_v4 = vadd.f32 %v443_v62, %v437_v47  ;;  %v636_v47 = vmax.f32 %v635_v46, 0.0 }
 0x328   :  { %v451_v2 = vpop.permute.xlu1 %450 }
 0x329   :  { %v453_v7 = vadd.f32 %v451_v2, %v445_v4  ;;  %v638_v50 = vadd.f32 1e-05, %v636_v47 }
 0x32a   :  { %v475_v5 = vpop.permute.xlu0 %474 }
 0x32c   :  { %v459_v6 = vpop.permute.xlu1 %458 }
 0x32d   :  { %v461_v8 = vadd.f32 %v459_v6, %v453_v7 }
 0x32e   :  { %v491_v11 = vpop.permute.xlu0 %490 }
 0x330   :  { %v467_v9 = vpop.permute.xlu1 %466 }
 0x331   :  { %v469_v10 = vadd.f32 %v467_v9, %v461_v8 }
 0x332   :  { %v507_v18 = vpop.permute.xlu0 %506 }
 0x333   :  { %v477_v12 = vadd.f32 %v475_v5, %v469_v10 }
 0x334   :  { %v483_v13 = vpop.permute.xlu1 %482 }
 0x335   :  { %v485_v14 = vadd.f32 %v483_v13, %v477_v12 }
 0x336   :  { %v523_v25 = vpop.permute.xlu0 %522 }
 0x337   :  { %v493_v16 = vadd.f32 %v491_v11, %v485_v14 }
 0x338   :  { %v499_v19 = vpop.permute.xlu1 %498 }
 0x339   :  { %v501_v20 = vadd.f32 %v499_v19, %v493_v16 }
 0x33b   :  { %v509_v21 = vadd.f32 %v507_v18, %v501_v20 }
 0x33c   :  { %v515_v23 = vpop.permute.xlu1 %514 }
 0x33d   :  { %v517_v24 = vadd.f32 %v515_v23, %v509_v21 }
 0x33f   :  { %v525_v26 = vadd.f32 %v523_v25, %v517_v24 }
 0x340   :  { %v531_v27 = vpop.permute.xlu1 %530 }
 0x341   :  { %v533_v28 = vadd.f32 %v531_v27, %v525_v26 }
 0x343   :  { %v534_v29 = vmul.f32 0.5, %v533_v28 }
 0x345   :  { %784 = vtanh.f32 %v534_v29 }
 0x346   :  { %786 = vrsqrt.f32 %v638_v50 }
 0x34f   :  { %v785_v31 = vpop.eup %784 }
 0x350   :  { %v536_v32 = vadd.f32 1.0, %v785_v31  ;;  %v787_v17 = vpop.eup %786 }
 0x351   :  { %v640_v38 = vmul.f32 %v787_v17, %v637_v51 }
 0x352   :  { %v537_v33 = vmul.f32 0.5, %v536_v32 }
 0x353   :  { %v642_v52 = vmul.f32 %v640_v38, %v631_v42  ;;  %v648_v41 = vrot.slane %v640_v38, %v934_v22 }
 0x354   :  { %v541_v34 = vrot.slane %v537_v33, %v934_v22  ;;  %v552_v36 = vrot.slane %v537_v33, %v551_v35 }
 0x355   :  { %v643_v53 = vsub.f32 %v641_v40, %v642_v52  ;;  %v650_v54 = vmul.f32 %v648_v41, %v615_v0  ;;  %v651_v55 = vmul.f32 %v648_v41, %v618_v30  ;;  %v652_v62 = vmul.f32 %v1022_v63, %v648_v41 }
 0x356   :  { %547 = vbcast.lane.b32.xlu1 %v541_v34, 264  ;;  %543 = vbcast.lane.b32.xlu0 %v541_v34, 256  ;;  %v653_v2 = vmul.f32 %v760_v3, %v648_v41 }
 0x357   :  { %v662_v58 = vrot.slane %v643_v53, %v934_v22 }
 0x35a   :  { %558 = vbcast.lane.b32.xlu1 %v552_v36, 264  ;;  %554 = vbcast.lane.b32.xlu0 %v552_v36, 256 }
 0x3c8   :  { %v548_v56 = vpop.permute.xlu1 %547  ;;  %v544_v1 = vpop.permute.xlu0 %543 }
 0x3c9   :  { %v561_v57 = vmul.f32 %v548_v56, %v969_v49  ;;  %v560_v59 = vmul.f32 %v544_v1, %v966_v48 }
 0x3cb   :  { %v654_v60 = vadd.f32 %v650_v54, %v560_v59  ;;  %v655_v61 = vadd.f32 %v651_v55, %v561_v57 }
 0x3cc   :  { %v559_v4 = vpop.permute.xlu1 %558  ;;  %v555_v5 = vpop.permute.xlu0 %554 }
 0x3cd   :  { %v664_v6 = vadd.f32 %v662_v58, %v654_v60  ;;  %v665_v7 = vadd.f32 %v662_v58, %v655_v61  ;;  %v563_v0 = vmul.f32 %v559_v4, %v983_v39  ;;  %v562_v8 = vmul.f32 %v555_v5, %v976_v15 }
 0x3cf   :  { %v668_v9 = vmax.f32 %v664_v6, 0.0  ;;  %v669_v49 = vmax.f32 %v665_v7, 0.0  ;;  %v657_v10 = vadd.f32 %v653_v2, %v563_v0  ;;  %v656_v22 = vadd.f32 %v652_v62, %v562_v8 }
 0x3d1   :  { %673 = vst.msk [vmem:[%s1069_s12] sm:$0xff] %vm672_vm12, %v668_v9  ;;  %674 = vst.msk [vmem:[%s1069_s12 + $0x8] sm:$0xff] %vm672_vm12, %v669_v49  ;;  %v667_v48 = vadd.f32 %v662_v58, %v657_v10  ;;  %v666_v63 = vadd.f32 %v662_v58, %v656_v22 }
 0x3d3   :  { %v671_v3 = vmax.f32 %v667_v48, 0.0  ;;  %v670_v11 = vmax.f32 %v666_v63, 0.0 }
 0x3d5   :  { %676 = vst.msk [vmem:[%s1069_s12 + $0x18] sm:$0xff] %vm672_vm12, %v671_v3  ;;  %675 = vst.msk [vmem:[%s1069_s12 + $0x10] sm:$0xff] %vm672_vm12, %v670_v11 }
 0x3d6   :  { %681 = vsyncpa [#allocation4], 1 }

</bundles_post_ra>
